<compile_context>
chip_gen: v7x
topology: tpu7x:2x2x1
jax: 0.10.0
libtpu: 0.0.40
codegen_flags: <defaults>
</compile_context>

<pallas_src>
import jax
import jax.numpy as jnp
import numpy as np
from jax.experimental import pallas as pl
from jax.experimental.pallas import tpu as pltpu


def _round_up(x, m):
    return (x + m - 1) // m * m


def _pad2(a, shape):
    pads = [(0, shape[i] - a.shape[i]) for i in range(a.ndim)]
    if all(p == (0, 0) for p in pads):
        return a
    return jnp.pad(a, pads)


def _fast_recip(x):
    """EUP approximate reciprocal + one Newton refinement (~f32 exact)."""
    r = pl.reciprocal(x, approx=True)
    return r * (2.0 - x * r)


def etm_forward(X, Xn, params, *, v_tile=512):
    assert v_tile % 128 == 0, "v_tile must be a multiple of 128 (lane width)"
    B, V = X.shape
    H = params["w1"].shape[1]
    K = params["wmu"].shape[1]
    L = params["rho"].shape[1]

    Kp = _round_up(K, 128)        # lane-dense topics (mu / ls / theta softmax)
    K8 = _round_up(K, 8)          # sublane-aligned topics (beta / decode path)
    Hp = _round_up(H, 128)        # lane-dense hidden
    Lp = _round_up(L, 8)          # sublane-aligned embedding dim
    Vp = _round_up(V, v_tile)     # vocab padded to tile multiple
    nV = Vp // v_tile

    f32 = jnp.float32
    # ---- wrapper-side padding / pre-transposition (zero-padding is exact) ----
    w1 = _pad2(params["w1"].astype(f32), (Vp, Hp))
    b1 = _pad2(params["b1"].astype(f32), (1, Hp))
    w2 = _pad2(params["w2"].astype(f32), (Hp, Hp))
    b2 = _pad2(params["b2"].astype(f32), (1, Hp))
    # fused mu | logsigma projection: one [Hp, 2*Kp] matmul
    w_muls = jnp.concatenate(
        [_pad2(params["wmu"].astype(f32), (Hp, Kp)),
         _pad2(params["wls"].astype(f32), (Hp, Kp))], axis=1)
    b_muls = jnp.concatenate(
        [_pad2(params["bmu"].astype(f32), (1, Kp)),
         _pad2(params["bls"].astype(f32), (1, Kp))], axis=1)
    walpha_T = _pad2(params["walpha"].astype(f32).T, (K8, Lp))   # [K8, Lp]
    rho_T = _pad2(params["rho"].astype(f32).T, (Lp, Vp))          # [Lp, Vp]
    Xp = _pad2(X.astype(f32), (B, Vp))
    Xnp = _pad2(Xn.astype(f32), (B, Vp))

    def kernel(x_ref, xn_ref, w1_ref, b1_ref, w2_ref, b2_ref,
               wmuls_ref, bmuls_ref, wat_ref, rhot_ref,
               recon_ref, kld_ref, theta_ref, beta_ref,
               h1_acc, theta_s, m_s, s_s, recon_acc):
        p = pl.program_id(0)          # pass (0: stats, 1: emit)
        v = pl.program_id(1)          # vocab tile
        nv = pl.num_programs(1)

        @pl.when((p == 0) & (v == 0))
        def _init():
            h1_acc[...] = jnp.zeros_like(h1_acc)
            m_s[...] = jnp.full_like(m_s, -1e30)
            s_s[...] = jnp.zeros_like(s_s)
            recon_acc[...] = jnp.zeros_like(recon_acc)

        # beta logits in [K8, v_tile] layout (lane-dense over V); needed in both
        # passes (pass 0: online-softmax stats, pass 1: normalized beta tile).
        logits = jnp.dot(wat_ref[...], rhot_ref[...],
                         preferred_element_type=jnp.float32)
        if Vp > V:  # trace-time guard; cheap [1, v_tile] additive mask
            col = v * v_tile + jax.lax.broadcasted_iota(jnp.int32, (1, v_tile), 1)
            logits = logits + jnp.where(col < V, 0.0, -1e30)

        # ---- pass 0: encoder partial sum + online softmax stats over V ----
        @pl.when(p == 0)
        def _pass0():
            h1_acc[...] += jnp.dot(xn_ref[...], w1_ref[...],
                                   preferred_element_type=jnp.float32)
            m_new = jnp.maximum(m_s[...], jnp.max(logits, axis=-1, keepdims=True))
            s_s[...] = (s_s[...] * jnp.exp(m_s[...] - m_new)
                        + jnp.sum(jnp.exp(logits - m_new), axis=-1, keepdims=True))
            m_s[...] = m_new

        # ---- start of pass 1: finalize encoder -> kld, theta ----
        @pl.when((p == 1) & (v == 0))
        def _encoder_finalize():
            h1 = jnp.maximum(h1_acc[...] + b1_ref[...], 0.0)
            h2 = jnp.maximum(
                jnp.dot(h1, w2_ref[...], preferred_element_type=jnp.float32)
                + b2_ref[...], 0.0)
            muls = jnp.dot(h2, wmuls_ref[...],
                           preferred_element_type=jnp.float32) + bmuls_ref[...]
            mu = muls[:, :Kp]
            ls = muls[:, Kp:]
            # padded K columns have mu = ls = 0 -> contribute exactly 0
            kld_ref[...] = -0.5 * jnp.sum(1.0 + ls - mu * mu - jnp.exp(ls),
                                          axis=-1, keepdims=True)       # [B, 1]
            if Kp > K:  # exclude padded topics from the theta softmax
                kcol = jax.lax.broadcasted_iota(jnp.int32, (B, Kp), 1)
                mu = jnp.where(kcol < K, mu, -1e30)
            zc = mu - jnp.max(mu, axis=-1, keepdims=True)
            ez = jnp.exp(zc)
            theta = ez * _fast_recip(jnp.sum(ez, axis=-1, keepdims=True))
            theta_s[...] = theta
            theta_ref[...] = theta

        # ---- pass 1: beta tile + fused decode + recon accumulation ----
        @pl.when(p == 1)
        def _pass1():
            # write beta first; feed the decode matmul from the output ref to
            # limit live [K8, v_tile] temporaries at larger tiles.
            beta_ref[...] = jnp.exp(logits - m_s[...]) * _fast_recip(s_s[...])
            res_t = jnp.dot(theta_s[:, :K8], beta_ref[...],
                            preferred_element_type=jnp.float32)         # [B, vt]
            # padded vocab lanes have x == 0 -> contribute exactly 0
            recon_acc[...] += jnp.log(res_t + 1e-6) * x_ref[...]

            @pl.when(v == nv - 1)
            def _finalize():
                recon_ref[...] = -jnp.sum(recon_acc[...], axis=-1,
                                          keepdims=True)                 # [B, 1]

    out_shape = (
        jax.ShapeDtypeStruct((B, 1), jnp.float32),    # per-doc recon loss
        jax.ShapeDtypeStruct((B, 1), jnp.float32),    # per-doc kld
        jax.ShapeDtypeStruct((B, Kp), jnp.float32),   # theta (padded K)
        jax.ShapeDtypeStruct((K8, Vp), jnp.float32),  # beta  (padded K, V)
    )
    in_specs = [
        # X: only needed in pass 1 -> constant block during pass 0
        pl.BlockSpec((B, v_tile), lambda p, v: (0, v * p)),
        # X_normalized / w1: only needed in pass 0 -> constant block in pass 1
        pl.BlockSpec((B, v_tile), lambda p, v: (0, v * (1 - p))),
        pl.BlockSpec((v_tile, Hp), lambda p, v: (v * (1 - p), 0)),
        pl.BlockSpec((1, Hp), lambda p, v: (0, 0)),           # b1
        pl.BlockSpec((Hp, Hp), lambda p, v: (0, 0)),          # w2
        pl.BlockSpec((1, Hp), lambda p, v: (0, 0)),           # b2
        pl.BlockSpec((Hp, 2 * Kp), lambda p, v: (0, 0)),      # w_mu|w_ls fused
        pl.BlockSpec((1, 2 * Kp), lambda p, v: (0, 0)),       # b_mu|b_ls fused
        pl.BlockSpec((K8, Lp), lambda p, v: (0, 0)),          # walpha^T
        pl.BlockSpec((Lp, v_tile), lambda p, v: (0, v)),      # rho^T (both passes)
    ]
    out_specs = (
        pl.BlockSpec((B, 1), lambda p, v: (0, 0)),            # recon per doc
        pl.BlockSpec((B, 1), lambda p, v: (0, 0)),            # kld per doc
        pl.BlockSpec((B, Kp), lambda p, v: (0, 0)),           # theta
        # beta blocks only step (and are only written back) during pass 1
        pl.BlockSpec((K8, v_tile), lambda p, v: (0, v * p)),
    )
    scratch_shapes = [
        pltpu.VMEM((B, Hp), jnp.float32),      # h1 accumulator (encoder partials)
        pltpu.VMEM((B, Kp), jnp.float32),      # theta (persisted for decode)
        pltpu.VMEM((K8, 1), jnp.float32),      # running max over V (beta softmax)
        pltpu.VMEM((K8, 1), jnp.float32),      # running sum over V (beta softmax)
        pltpu.VMEM((B, v_tile), jnp.float32),  # elementwise recon accumulator
    ]

    recon_vec, kld_vec, theta_p, beta_p = pl.pallas_call(
        kernel,
        out_shape=out_shape,
        grid=(2, nV),
        in_specs=in_specs,
        out_specs=out_specs,
        scratch_shapes=scratch_shapes,
        compiler_params=pltpu.CompilerParams(
            # both axes carry accumulator dependencies -> sequential ("arbitrary")
            dimension_semantics=("arbitrary", "arbitrary"),
            # 48 MiB cap is safe on v7x (64 MiB physical) and leaves room for
            # v_tile up to ~1024 at realistic H; v5e/v6e can go larger.
            vmem_limit_bytes=48 * 1024 * 1024,
        ),
    )(Xp, Xnp, w1, b1, w2, b2, w_muls, b_muls, walpha_T, rho_T)

    recon = jnp.mean(recon_vec)   # batch mean (aggregate=True)
    kld = jnp.mean(kld_vec)
    return recon, kld, theta_p[:, :K], beta_p[:K, :V]


def etm_reference(X, Xn, params):
    """Pure-JAX reference mirroring ETM.forward in eval mode."""
    h1 = jnp.maximum(Xn @ params["w1"] + params["b1"], 0.0)
    h2 = jnp.maximum(h1 @ params["w2"] + params["b2"], 0.0)
    mu = h2 @ params["wmu"] + params["bmu"]
    ls = h2 @ params["wls"] + params["bls"]
    kld = -0.5 * jnp.mean(jnp.sum(1.0 + ls - mu ** 2 - jnp.exp(ls), axis=-1))
    theta = jax.nn.softmax(mu, axis=-1)
    beta = jax.nn.softmax(params["rho"] @ params["walpha"], axis=0).T
    preds = jnp.log(theta @ beta + 1e-6)
    recon = jnp.mean(-(preds * X).sum(axis=1))
    return recon, kld, theta, beta


def init_params(key, V, H, K, L):
    ks = jax.random.split(key, 8)
    s = 0.05
    return {
        "w1": jax.random.normal(ks[0], (V, H), jnp.float32) * s,
        "b1": jnp.zeros((1, H), jnp.float32),
        "w2": jax.random.normal(ks[1], (H, H), jnp.float32) * s,
        "b2": jnp.zeros((1, H), jnp.float32),
        "wmu": jax.random.normal(ks[2], (H, K), jnp.float32) * s,
        "bmu": jnp.zeros((1, K), jnp.float32),
        "wls": jax.random.normal(ks[3], (H, K), jnp.float32) * s,
        "bls": jnp.zeros((1, K), jnp.float32),
        "rho": jax.random.normal(ks[4], (V, L), jnp.float32),   # torch.randn(V, rho_size)
        "walpha": jax.random.normal(ks[5], (L, K), jnp.float32) * s,
    }


if __name__ == "__main__":
    # batch, vocab, t_hidden, num_topics, rho_size (small demo shapes).
    # v_tile=128 here so the multi-tile / vocab-padding / pass-dependent-index
    # paths are exercised (V=320 -> Vp=384, 3 tiles); default is 512 for real V.
    B, V, H, K, L = 8, 320, 64, 16, 32

    key = jax.random.PRNGKey(0)
    kx, kp = jax.random.split(key)

    # synthetic bag-of-words counts (non-negative) and row-normalized version
    X = jnp.floor(jax.random.uniform(kx, (B, V), jnp.float32) * 5.0)
    Xn = X / jnp.sum(X, axis=1, keepdims=True)

    params = init_params(kp, V, H, K, L)

    recon, kld, theta, beta = etm_forward(X, Xn, params, v_tile=128)
    jax.block_until_ready((recon, kld, theta, beta))

    r_ref, k_ref, t_ref, b_ref = etm_reference(X, Xn, params)
    np.testing.assert_allclose(np.array(recon), np.array(r_ref), rtol=1e-4, atol=1e-4)
    np.testing.assert_allclose(np.array(kld), np.array(k_ref), rtol=1e-4, atol=1e-4)
    np.testing.assert_allclose(np.array(theta), np.array(t_ref), rtol=1e-4, atol=1e-5)
    np.testing.assert_allclose(np.array(beta), np.array(b_ref), rtol=1e-4, atol=1e-5)

    print("KERNEL_OK")
</pallas_src>

<mosaic_0001>
module attributes {stable_mosaic.version = 11 : i64} {
  func.func @kernel(%arg0: i32, %arg1: i32, %arg2: memref<8x128xf32, #tpu.memory_space<vmem>>, %arg3: memref<8x128xf32, #tpu.memory_space<vmem>>, %arg4: memref<128x128xf32, #tpu.memory_space<vmem>>, %arg5: memref<1x128xf32, #tpu.memory_space<vmem>>, %arg6: memref<128x128xf32, #tpu.memory_space<vmem>>, %arg7: memref<1x128xf32, #tpu.memory_space<vmem>>, %arg8: memref<128x256xf32, #tpu.memory_space<vmem>>, %arg9: memref<1x256xf32, #tpu.memory_space<vmem>>, %arg10: memref<16x32xf32, #tpu.memory_space<vmem>>, %arg11: memref<32x128xf32, #tpu.memory_space<vmem>>, %arg12: memref<8x1xf32, #tpu.memory_space<vmem>>, %arg13: memref<8x1xf32, #tpu.memory_space<vmem>>, %arg14: memref<8x128xf32, #tpu.memory_space<vmem>>, %arg15: memref<16x128xf32, #tpu.memory_space<vmem>>, %arg16: memref<8x128xf32, #tpu.memory_space<vmem>>, %arg17: memref<8x128xf32, #tpu.memory_space<vmem>>, %arg18: memref<16x1xf32, #tpu.memory_space<vmem>>, %arg19: memref<16x1xf32, #tpu.memory_space<vmem>>, %arg20: memref<8x128xf32, #tpu.memory_space<vmem>>) attributes {dimension_semantics = [#tpu.dimension_semantics<arbitrary>, #tpu.dimension_semantics<arbitrary>], iteration_bounds = array<i64: 2, 3>, scalar_prefetch = 0 : i64, scratch_operands = 5 : i64, tpu.core_type = #tpu.core_type<tc>, window_params = [{transform_indices = @transform_0, window_bounds = array<i64: 8, 128>}, {transform_indices = @transform_1, window_bounds = array<i64: 8, 128>}, {transform_indices = @transform_2, window_bounds = array<i64: 128, 128>}, {pipeline_mode = #tpu.pipeline_mode<synchronous>, transform_indices = @transform_3, window_bounds = array<i64: 1, 128>}, {pipeline_mode = #tpu.pipeline_mode<synchronous>, transform_indices = @transform_4, window_bounds = array<i64: 128, 128>}, {pipeline_mode = #tpu.pipeline_mode<synchronous>, transform_indices = @transform_5, window_bounds = array<i64: 1, 128>}, {pipeline_mode = #tpu.pipeline_mode<synchronous>, transform_indices = @transform_6, window_bounds = array<i64: 128, 256>}, {pipeline_mode = #tpu.pipeline_mode<synchronous>, transform_indices = @transform_7, window_bounds = array<i64: 1, 256>}, {pipeline_mode = #tpu.pipeline_mode<synchronous>, transform_indices = @transform_8, window_bounds = array<i64: 16, 32>}, {transform_indices = @transform_9, window_bounds = array<i64: 32, 128>}, {pipeline_mode = #tpu.pipeline_mode<synchronous>, transform_indices = @transform_10, window_bounds = array<i64: 8, 1>}, {pipeline_mode = #tpu.pipeline_mode<synchronous>, transform_indices = @transform_11, window_bounds = array<i64: 8, 1>}, {pipeline_mode = #tpu.pipeline_mode<synchronous>, transform_indices = @transform_12, window_bounds = array<i64: 8, 128>}, {transform_indices = @transform_13, window_bounds = array<i64: 16, 128>}]} {
    %c0_i32 = arith.constant 0 : i32
    %0 = arith.cmpi eq, %arg0, %c0_i32 : i32
    %c0_i32_0 = arith.constant 0 : i32
    %1 = arith.cmpi eq, %arg1, %c0_i32_0 : i32
    %2 = arith.andi %0, %1 : i1
    %3 = arith.extui %2 : i1 to i32
    %c0_i32_1 = arith.constant 0 : i32
    %4 = arith.cmpi ne, %3, %c0_i32_1 : i32
    scf.if %4 {
      %cst_13 = arith.constant 0.000000e+00 : f32
      %30 = vector.broadcast %cst_13 : f32 to vector<8x128xf32>
      %c0_14 = arith.constant 0 : index
      %c0_15 = arith.constant 0 : index
      %31 = vector.load %arg16[%c0_14, %c0_15] : memref<8x128xf32, #tpu.memory_space<vmem>>, vector<8x128xf32>
      tpu.vector_store %arg16[%c0_14, %c0_15], %30 {strides = array<i32>} : memref<8x128xf32, #tpu.memory_space<vmem>>, vector<8x128xf32>,
      %cst_16 = arith.constant -1.000000e+30 : f32
      %32 = vector.broadcast %cst_16 : f32 to vector<16x1xf32>
      %c0_17 = arith.constant 0 : index
      %c0_18 = arith.constant 0 : index
      %33 = vector.load %arg18[%c0_17, %c0_18] : memref<16x1xf32, #tpu.memory_space<vmem>>, vector<16x1xf32>
      tpu.vector_store %arg18[%c0_17, %c0_18], %32 {strides = array<i32>} : memref<16x1xf32, #tpu.memory_space<vmem>>, vector<16x1xf32>,
      %cst_19 = arith.constant 0.000000e+00 : f32
      %34 = vector.broadcast %cst_19 : f32 to vector<16x1xf32>
      %c0_20 = arith.constant 0 : index
      %c0_21 = arith.constant 0 : index
      %35 = vector.load %arg19[%c0_20, %c0_21] : memref<16x1xf32, #tpu.memory_space<vmem>>, vector<16x1xf32>
      tpu.vector_store %arg19[%c0_20, %c0_21], %34 {strides = array<i32>} : memref<16x1xf32, #tpu.memory_space<vmem>>, vector<16x1xf32>,
      %cst_22 = arith.constant 0.000000e+00 : f32
      %36 = vector.broadcast %cst_22 : f32 to vector<8x128xf32>
      %c0_23 = arith.constant 0 : index
      %c0_24 = arith.constant 0 : index
      %37 = vector.load %arg20[%c0_23, %c0_24] : memref<8x128xf32, #tpu.memory_space<vmem>>, vector<8x128xf32>
      tpu.vector_store %arg20[%c0_23, %c0_24], %36 {strides = array<i32>} : memref<8x128xf32, #tpu.memory_space<vmem>>, vector<8x128xf32>,
    } else {
    }
    %c0 = arith.constant 0 : index
    %c0_2 = arith.constant 0 : index
    %5 = vector.load %arg10[%c0, %c0_2] : memref<16x32xf32, #tpu.memory_space<vmem>>, vector<16x32xf32>
    %c0_3 = arith.constant 0 : index
    %c0_4 = arith.constant 0 : index
    %6 = vector.load %arg11[%c0_3, %c0_4] : memref<32x128xf32, #tpu.memory_space<vmem>>, vector<32x128xf32>
    %cst = arith.constant dense<0.000000e+00> : vector<16x128xf32>
    %7 = tpu.matmul %5, %6, %cst {dimension_numbers = #tpu.dot_dimension_numbers<[1], [0], [0], [1], [0, 0, 1, 1], [], []>} : vector<16x32xf32>, vector<32x128xf32>, vector<16x128xf32> -> vector<16x128xf32>
    %c128_i32 = arith.constant 128 : i32
    %8 = arith.muli %arg1, %c128_i32 : i32
    %9 = tpu.iota {dimensions = array<i32: 1>} : vector<1x128xi32>
    %10 = vector.broadcast %8 : i32 to vector<1x128xi32>
    %11 = arith.addi %10, %9 : vector<1x128xi32>
    %c320_i32 = arith.constant 320 : i32
    %12 = vector.broadcast %c320_i32 : i32 to vector<1x128xi32>
    %13 = arith.cmpi slt, %11, %12 : vector<1x128xi32>
    %cst_5 = arith.constant 0.000000e+00 : f32
    %cst_6 = arith.constant -1.000000e+30 : f32
    %14 = vector.broadcast %cst_5 : f32 to vector<1x128xf32>
    %15 = vector.broadcast %cst_6 : f32 to vector<1x128xf32>
    %16 = arith.select %13, %14, %15 : vector<1x128xi1>, vector<1x128xf32>
    %17 = vector.broadcast %16 : vector<1x128xf32> to vector<16x128xf32>
    %18 = arith.addf %7, %17 : vector<16x128xf32>
    %c0_i32_7 = arith.constant 0 : i32
    %19 = arith.cmpi eq, %arg0, %c0_i32_7 : i32
    %20 = arith.extui %19 : i1 to i32
    %c0_i32_8 = arith.constant 0 : i32
    %21 = arith.cmpi ne, %20, %c0_i32_8 : i32
    scf.if %21 {
      %c0_13 = arith.constant 0 : index
      %c0_14 = arith.constant 0 : index
      %30 = vector.load %arg16[%c0_13, %c0_14] : memref<8x128xf32, #tpu.memory_space<vmem>>, vector<8x128xf32>
      %c0_15 = arith.constant 0 : index
      %c0_16 = arith.constant 0 : index
      %31 = vector.load %arg3[%c0_15, %c0_16] : memref<8x128xf32, #tpu.memory_space<vmem>>, vector<8x128xf32>
      %c0_17 = arith.constant 0 : index
      %c0_18 = arith.constant 0 : index
      %32 = vector.load %arg4[%c0_17, %c0_18] : memref<128x128xf32, #tpu.memory_space<vmem>>, vector<128x128xf32>
      %cst_19 = arith.constant dense<0.000000e+00> : vector<8x128xf32>
      %33 = tpu.matmul %31, %32, %cst_19 {dimension_numbers = #tpu.dot_dimension_numbers<[1], [0], [0], [1], [0, 0, 1, 1], [], []>} : vector<8x128xf32>, vector<128x128xf32>, vector<8x128xf32> -> vector<8x128xf32>
      %34 = arith.addf %30, %33 : vector<8x128xf32>
      %c0_20 = arith.constant 0 : index
      %c0_21 = arith.constant 0 : index
      %35 = vector.load %arg16[%c0_20, %c0_21] : memref<8x128xf32, #tpu.memory_space<vmem>>, vector<8x128xf32>
      tpu.vector_store %arg16[%c0_20, %c0_21], %34 {strides = array<i32>} : memref<8x128xf32, #tpu.memory_space<vmem>>, vector<8x128xf32>,
      %c0_22 = arith.constant 0 : index
      %c0_23 = arith.constant 0 : index
      %36 = vector.load %arg18[%c0_22, %c0_23] : memref<16x1xf32, #tpu.memory_space<vmem>>, vector<16x1xf32>
      %cst_24 = arith.constant dense<0xFF800000> : vector<16xf32>
      %37 = vector.multi_reduction <maximumf>, %18, %cst_24 [1] : vector<16x128xf32> to vector<16xf32>
      %38 = vector.shape_cast %37 : vector<16xf32> to vector<16x1xf32>
      %39 = arith.maximumf %36, %38 : vector<16x1xf32>
      %c0_25 = arith.constant 0 : index
      %c0_26 = arith.constant 0 : index
      %40 = vector.load %arg19[%c0_25, %c0_26] : memref<16x1xf32, #tpu.memory_space<vmem>>, vector<16x1xf32>
      %c0_27 = arith.constant 0 : index
      %c0_28 = arith.constant 0 : index
      %41 = vector.load %arg18[%c0_27, %c0_28] : memref<16x1xf32, #tpu.memory_space<vmem>>, vector<16x1xf32>
      %42 = arith.subf %41, %39 : vector<16x1xf32>
      %43 = math.exp %42 : vector<16x1xf32>
      %44 = arith.mulf %40, %43 : vector<16x1xf32>
      %45 = vector.broadcast %39 : vector<16x1xf32> to vector<16x128xf32>
      %46 = arith.subf %18, %45 : vector<16x128xf32>
      %47 = math.exp %46 : vector<16x128xf32>
      %cst_29 = arith.constant dense<0.000000e+00> : vector<16xf32>
      %48 = vector.multi_reduction <add>, %47, %cst_29 [1] : vector<16x128xf32> to vector<16xf32>
      %49 = vector.shape_cast %48 : vector<16xf32> to vector<16x1xf32>
      %50 = arith.addf %44, %49 : vector<16x1xf32>
      %c0_30 = arith.constant 0 : index
      %c0_31 = arith.constant 0 : index
      %51 = vector.load %arg19[%c0_30, %c0_31] : memref<16x1xf32, #tpu.memory_space<vmem>>, vector<16x1xf32>
      tpu.vector_store %arg19[%c0_30, %c0_31], %50 {strides = array<i32>} : memref<16x1xf32, #tpu.memory_space<vmem>>, vector<16x1xf32>,
      %c0_32 = arith.constant 0 : index
      %c0_33 = arith.constant 0 : index
      %52 = vector.load %arg18[%c0_32, %c0_33] : memref<16x1xf32, #tpu.memory_space<vmem>>, vector<16x1xf32>
      tpu.vector_store %arg18[%c0_32, %c0_33], %39 {strides = array<i32>} : memref<16x1xf32, #tpu.memory_space<vmem>>, vector<16x1xf32>,
    } else {
    }
    %c1_i32 = arith.constant 1 : i32
    %22 = arith.cmpi eq, %arg0, %c1_i32 : i32
    %c0_i32_9 = arith.constant 0 : i32
    %23 = arith.cmpi eq, %arg1, %c0_i32_9 : i32
    %24 = arith.andi %22, %23 : i1
    %25 = arith.extui %24 : i1 to i32
    %c0_i32_10 = arith.constant 0 : i32
    %26 = arith.cmpi ne, %25, %c0_i32_10 : i32
    scf.if %26 {
      %c0_13 = arith.constant 0 : index
      %c0_14 = arith.constant 0 : index
      %30 = vector.load %arg16[%c0_13, %c0_14] : memref<8x128xf32, #tpu.memory_space<vmem>>, vector<8x128xf32>
      %c0_15 = arith.constant 0 : index
      %c0_16 = arith.constant 0 : index
      %31 = vector.load %arg5[%c0_15, %c0_16] : memref<1x128xf32, #tpu.memory_space<vmem>>, vector<1x128xf32>
      %32 = vector.broadcast %31 : vector<1x128xf32> to vector<8x128xf32>
      %33 = arith.addf %30, %32 : vector<8x128xf32>
      %cst_17 = arith.constant 0.000000e+00 : f32
      %34 = vector.broadcast %cst_17 : f32 to vector<8x128xf32>
      %35 = arith.maximumf %33, %34 : vector<8x128xf32>
      %c0_18 = arith.constant 0 : index
      %c0_19 = arith.constant 0 : index
      %36 = vector.load %arg6[%c0_18, %c0_19] : memref<128x128xf32, #tpu.memory_space<vmem>>, vector<128x128xf32>
      %cst_20 = arith.constant dense<0.000000e+00> : vector<8x128xf32>
      %37 = tpu.matmul %35, %36, %cst_20 {dimension_numbers = #tpu.dot_dimension_numbers<[1], [0], [0], [1], [0, 0, 1, 1], [], []>} : vector<8x128xf32>, vector<128x128xf32>, vector<8x128xf32> -> vector<8x128xf32>
      %c0_21 = arith.constant 0 : index
      %c0_22 = arith.constant 0 : index
      %38 = vector.load %arg7[%c0_21, %c0_22] : memref<1x128xf32, #tpu.memory_space<vmem>>, vector<1x128xf32>
      %39 = vector.broadcast %38 : vector<1x128xf32> to vector<8x128xf32>
      %40 = arith.addf %37, %39 : vector<8x128xf32>
      %cst_23 = arith.constant 0.000000e+00 : f32
      %41 = vector.broadcast %cst_23 : f32 to vector<8x128xf32>
      %42 = arith.maximumf %40, %41 : vector<8x128xf32>
      %c0_24 = arith.constant 0 : index
      %c0_25 = arith.constant 0 : index
      %43 = vector.load %arg8[%c0_24, %c0_25] : memref<128x256xf32, #tpu.memory_space<vmem>>, vector<128x256xf32>
      %cst_26 = arith.constant dense<0.000000e+00> : vector<8x256xf32>
      %44 = tpu.matmul %42, %43, %cst_26 {dimension_numbers = #tpu.dot_dimension_numbers<[1], [0], [0], [1], [0, 0, 1, 1], [], []>} : vector<8x128xf32>, vector<128x256xf32>, vector<8x256xf32> -> vector<8x256xf32>
      %c0_27 = arith.constant 0 : index
      %c0_28 = arith.constant 0 : index
      %45 = vector.load %arg9[%c0_27, %c0_28] : memref<1x256xf32, #tpu.memory_space<vmem>>, vector<1x256xf32>
      %46 = vector.broadcast %45 : vector<1x256xf32> to vector<8x256xf32>
      %47 = arith.addf %44, %46 : vector<8x256xf32>
      %48 = vector.extract_strided_slice %47 {offsets = [0, 0], sizes = [8, 128], strides = [1, 1]} : vector<8x256xf32> to vector<8x128xf32>
      %49 = vector.extract_strided_slice %47 {offsets = [0, 128], sizes = [8, 128], strides = [1, 1]} : vector<8x256xf32> to vector<8x128xf32>
      %cst_29 = arith.constant 1.000000e+00 : f32
      %50 = vector.broadcast %cst_29 : f32 to vector<8x128xf32>
      %51 = arith.addf %50, %49 : vector<8x128xf32>
      %52 = arith.mulf %48, %48 : vector<8x128xf32>
      %53 = arith.subf %51, %52 : vector<8x128xf32>
      %54 = math.exp %49 : vector<8x128xf32>
      %55 = arith.subf %53, %54 : vector<8x128xf32>
      %cst_30 = arith.constant dense<0.000000e+00> : vector<8xf32>
      %56 = vector.multi_reduction <add>, %55, %cst_30 [1] : vector<8x128xf32> to vector<8xf32>
      %57 = vector.shape_cast %56 : vector<8xf32> to vector<8x1xf32>
      %cst_31 = arith.constant -5.000000e-01 : f32
      %58 = vector.broadcast %cst_31 : f32 to vector<8x1xf32>
      %59 = arith.mulf %58, %57 : vector<8x1xf32>
      %c0_32 = arith.constant 0 : index
      %c0_33 = arith.constant 0 : index
      %60 = vector.load %arg13[%c0_32, %c0_33] : memref<8x1xf32, #tpu.memory_space<vmem>>, vector<8x1xf32>
      tpu.vector_store %arg13[%c0_32, %c0_33], %59 {strides = array<i32>} : memref<8x1xf32, #tpu.memory_space<vmem>>, vector<8x1xf32>,
      %61 = tpu.iota {dimensions = array<i32: 1>} : vector<8x128xi32>
      %c16_i32 = arith.constant 16 : i32
      %62 = vector.broadcast %c16_i32 : i32 to vector<8x128xi32>
      %63 = arith.cmpi slt, %61, %62 : vector<8x128xi32>
      %cst_34 = arith.constant -1.000000e+30 : f32
      %64 = vector.broadcast %cst_34 : f32 to vector<8x128xf32>
      %65 = arith.select %63, %48, %64 : vector<8x128xi1>, vector<8x128xf32>
      %cst_35 = arith.constant dense<0xFF800000> : vector<8xf32>
      %66 = vector.multi_reduction <maximumf>, %65, %cst_35 [1] : vector<8x128xf32> to vector<8xf32>
      %67 = vector.shape_cast %66 : vector<8xf32> to vector<8x1xf32>
      %68 = vector.broadcast %67 : vector<8x1xf32> to vector<8x128xf32>
      %69 = arith.subf %65, %68 : vector<8x128xf32>
      %70 = math.exp %69 : vector<8x128xf32>
      %cst_36 = arith.constant dense<0.000000e+00> : vector<8xf32>
      %71 = vector.multi_reduction <add>, %70, %cst_36 [1] : vector<8x128xf32> to vector<8xf32>
      %72 = vector.shape_cast %71 : vector<8xf32> to vector<8x1xf32>
      %73 = tpu.reciprocal %72 {approx = true} : vector<8x1xf32> -> vector<8x1xf32>
      %74 = arith.mulf %72, %73 : vector<8x1xf32>
      %cst_37 = arith.constant 2.000000e+00 : f32
      %75 = vector.broadcast %cst_37 : f32 to vector<8x1xf32>
      %76 = arith.subf %75, %74 : vector<8x1xf32>
      %77 = arith.mulf %73, %76 : vector<8x1xf32>
      %78 = vector.broadcast %77 : vector<8x1xf32> to vector<8x128xf32>
      %79 = arith.mulf %70, %78 : vector<8x128xf32>
      %c0_38 = arith.constant 0 : index
      %c0_39 = arith.constant 0 : index
      %80 = vector.load %arg17[%c0_38, %c0_39] : memref<8x128xf32, #tpu.memory_space<vmem>>, vector<8x128xf32>
      tpu.vector_store %arg17[%c0_38, %c0_39], %79 {strides = array<i32>} : memref<8x128xf32, #tpu.memory_space<vmem>>, vector<8x128xf32>,
      %c0_40 = arith.constant 0 : index
      %c0_41 = arith.constant 0 : index
      %81 = vector.load %arg14[%c0_40, %c0_41] : memref<8x128xf32, #tpu.memory_space<vmem>>, vector<8x128xf32>
      tpu.vector_store %arg14[%c0_40, %c0_41], %79 {strides = array<i32>} : memref<8x128xf32, #tpu.memory_space<vmem>>, vector<8x128xf32>,
    } else {
    }
    %c1_i32_11 = arith.constant 1 : i32
    %27 = arith.cmpi eq, %arg0, %c1_i32_11 : i32
    %28 = arith.extui %27 : i1 to i32
    %c0_i32_12 = arith.constant 0 : i32
    %29 = arith.cmpi ne, %28, %c0_i32_12 : i32
    scf.if %29 {
      %c0_13 = arith.constant 0 : index
      %c0_14 = arith.constant 0 : index
      %30 = vector.load %arg18[%c0_13, %c0_14] : memref<16x1xf32, #tpu.memory_space<vmem>>, vector<16x1xf32>
      %31 = vector.broadcast %30 : vector<16x1xf32> to vector<16x128xf32>
      %32 = arith.subf %18, %31 : vector<16x128xf32>
      %33 = math.exp %32 : vector<16x128xf32>
      %c0_15 = arith.constant 0 : index
      %c0_16 = arith.constant 0 : index
      %34 = vector.load %arg19[%c0_15, %c0_16] : memref<16x1xf32, #tpu.memory_space<vmem>>, vector<16x1xf32>
      %35 = tpu.reciprocal %34 {approx = true} : vector<16x1xf32> -> vector<16x1xf32>
      %36 = arith.mulf %34, %35 : vector<16x1xf32>
      %cst_17 = arith.constant 2.000000e+00 : f32
      %37 = vector.broadcast %cst_17 : f32 to vector<16x1xf32>
      %38 = arith.subf %37, %36 : vector<16x1xf32>
      %39 = arith.mulf %35, %38 : vector<16x1xf32>
      %40 = vector.broadcast %39 : vector<16x1xf32> to vector<16x128xf32>
      %41 = arith.mulf %33, %40 : vector<16x128xf32>
      %c0_18 = arith.constant 0 : index
      %c0_19 = arith.constant 0 : index
      %42 = vector.load %arg15[%c0_18, %c0_19] : memref<16x128xf32, #tpu.memory_space<vmem>>, vector<16x128xf32>
      tpu.vector_store %arg15[%c0_18, %c0_19], %41 {strides = array<i32>} : memref<16x128xf32, #tpu.memory_space<vmem>>, vector<16x128xf32>,
      %c0_20 = arith.constant 0 : index
      %c0_21 = arith.constant 0 : index
      %43 = vector.load %arg17[%c0_20, %c0_21] : memref<8x128xf32, #tpu.memory_space<vmem>>, vector<8x16xf32>
      %c0_22 = arith.constant 0 : index
      %c0_23 = arith.constant 0 : index
      %44 = vector.load %arg15[%c0_22, %c0_23] : memref<16x128xf32, #tpu.memory_space<vmem>>, vector<16x128xf32>
      %cst_24 = arith.constant dense<0.000000e+00> : vector<8x128xf32>
      %45 = tpu.matmul %43, %44, %cst_24 {dimension_numbers = #tpu.dot_dimension_numbers<[1], [0], [0], [1], [0, 0, 1, 1], [], []>} : vector<8x16xf32>, vector<16x128xf32>, vector<8x128xf32> -> vector<8x128xf32>
      %c0_25 = arith.constant 0 : index
      %c0_26 = arith.constant 0 : index
      %46 = vector.load %arg20[%c0_25, %c0_26] : memref<8x128xf32, #tpu.memory_space<vmem>>, vector<8x128xf32>
      %cst_27 = arith.constant 9.99999997E-7 : f32
      %47 = vector.broadcast %cst_27 : f32 to vector<8x128xf32>
      %48 = arith.addf %45, %47 : vector<8x128xf32>
      %49 = math.log %48 : vector<8x128xf32>
      %c0_28 = arith.constant 0 : index
      %c0_29 = arith.constant 0 : index
      %50 = vector.load %arg2[%c0_28, %c0_29] : memref<8x128xf32, #tpu.memory_space<vmem>>, vector<8x128xf32>
      %51 = arith.mulf %49, %50 : vector<8x128xf32>
      %52 = arith.addf %46, %51 : vector<8x128xf32>
      %c0_30 = arith.constant 0 : index
      %c0_31 = arith.constant 0 : index
      %53 = vector.load %arg20[%c0_30, %c0_31] : memref<8x128xf32, #tpu.memory_space<vmem>>, vector<8x128xf32>
      tpu.vector_store %arg20[%c0_30, %c0_31], %52 {strides = array<i32>} : memref<8x128xf32, #tpu.memory_space<vmem>>, vector<8x128xf32>,
      %c2_i32 = arith.constant 2 : i32
      %54 = arith.cmpi eq, %arg1, %c2_i32 : i32
      %55 = arith.extui %54 : i1 to i32
      %c0_i32_32 = arith.constant 0 : i32
      %56 = arith.cmpi ne, %55, %c0_i32_32 : i32
      scf.if %56 {
        %c0_33 = arith.constant 0 : index
        %c0_34 = arith.constant 0 : index
        %57 = vector.load %arg20[%c0_33, %c0_34] : memref<8x128xf32, #tpu.memory_space<vmem>>, vector<8x128xf32>
        %cst_35 = arith.constant dense<0.000000e+00> : vector<8xf32>
        %58 = vector.multi_reduction <add>, %57, %cst_35 [1] : vector<8x128xf32> to vector<8xf32>
        %59 = vector.shape_cast %58 : vector<8xf32> to vector<8x1xf32>
        %cst_36 = arith.constant 0.000000e+00 : f32
        %60 = vector.broadcast %cst_36 : f32 to vector<8x1xf32>
        %61 = arith.subf %60, %59 : vector<8x1xf32>
        %c0_37 = arith.constant 0 : index
        %c0_38 = arith.constant 0 : index
        %62 = vector.load %arg12[%c0_37, %c0_38] : memref<8x1xf32, #tpu.memory_space<vmem>>, vector<8x1xf32>
        tpu.vector_store %arg12[%c0_37, %c0_38], %61 {strides = array<i32>} : memref<8x1xf32, #tpu.memory_space<vmem>>, vector<8x1xf32>,
      } else {
      }
    } else {
    }
    return
  }
  func.func @transform_0(%arg0: i32, %arg1: i32) -> (i32, i32) {
    %0 = arith.muli %arg1, %arg0 : i32
    %c0_i32 = arith.constant 0 : i32
    %c0_i32_0 = arith.constant 0 : i32
    return %c0_i32, %0 : i32, i32
  }
  func.func @transform_1(%arg0: i32, %arg1: i32) -> (i32, i32) {
    %c1_i32 = arith.constant 1 : i32
    %0 = arith.subi %c1_i32, %arg0 : i32
    %1 = arith.muli %arg1, %0 : i32
    %c0_i32 = arith.constant 0 : i32
    %c0_i32_0 = arith.constant 0 : i32
    return %c0_i32, %1 : i32, i32
  }
  func.func @transform_2(%arg0: i32, %arg1: i32) -> (i32, i32) {
    %c1_i32 = arith.constant 1 : i32
    %0 = arith.subi %c1_i32, %arg0 : i32
    %1 = arith.muli %arg1, %0 : i32
    %c0_i32 = arith.constant 0 : i32
    %c0_i32_0 = arith.constant 0 : i32
    return %1, %c0_i32 : i32, i32
  }
  func.func @transform_3(%arg0: i32, %arg1: i32) -> (i32, i32) {
    %c0_i32 = arith.constant 0 : i32
    %c0_i32_0 = arith.constant 0 : i32
    %c0_i32_1 = arith.constant 0 : i32
    return %c0_i32, %c0_i32_0 : i32, i32
  }
  func.func @transform_4(%arg0: i32, %arg1: i32) -> (i32, i32) {
    %c0_i32 = arith.constant 0 : i32
    %c0_i32_0 = arith.constant 0 : i32
    %c0_i32_1 = arith.constant 0 : i32
    return %c0_i32, %c0_i32_0 : i32, i32
  }
  func.func @transform_5(%arg0: i32, %arg1: i32) -> (i32, i32) {
    %c0_i32 = arith.constant 0 : i32
    %c0_i32_0 = arith.constant 0 : i32
    %c0_i32_1 = arith.constant 0 : i32
    return %c0_i32, %c0_i32_0 : i32, i32
  }
  func.func @transform_6(%arg0: i32, %arg1: i32) -> (i32, i32) {
    %c0_i32 = arith.constant 0 : i32
    %c0_i32_0 = arith.constant 0 : i32
    %c0_i32_1 = arith.constant 0 : i32
    return %c0_i32, %c0_i32_0 : i32, i32
  }
  func.func @transform_7(%arg0: i32, %arg1: i32) -> (i32, i32) {
    %c0_i32 = arith.constant 0 : i32
    %c0_i32_0 = arith.constant 0 : i32
    %c0_i32_1 = arith.constant 0 : i32
    return %c0_i32, %c0_i32_0 : i32, i32
  }
  func.func @transform_8(%arg0: i32, %arg1: i32) -> (i32, i32) {
    %c0_i32 = arith.constant 0 : i32
    %c0_i32_0 = arith.constant 0 : i32
    %c0_i32_1 = arith.constant 0 : i32
    return %c0_i32, %c0_i32_0 : i32, i32
  }
  func.func @transform_9(%arg0: i32, %arg1: i32) -> (i32, i32) {
    %c0_i32 = arith.constant 0 : i32
    %c0_i32_0 = arith.constant 0 : i32
    return %c0_i32, %arg1 : i32, i32
  }
  func.func @transform_10(%arg0: i32, %arg1: i32) -> (i32, i32) {
    %c0_i32 = arith.constant 0 : i32
    %c0_i32_0 = arith.constant 0 : i32
    %c0_i32_1 = arith.constant 0 : i32
    return %c0_i32, %c0_i32_0 : i32, i32
  }
  func.func @transform_11(%arg0: i32, %arg1: i32) -> (i32, i32) {
    %c0_i32 = arith.constant 0 : i32
    %c0_i32_0 = arith.constant 0 : i32
    %c0_i32_1 = arith.constant 0 : i32
    return %c0_i32, %c0_i32_0 : i32, i32
  }
  func.func @transform_12(%arg0: i32, %arg1: i32) -> (i32, i32) {
    %c0_i32 = arith.constant 0 : i32
    %c0_i32_0 = arith.constant 0 : i32
    %c0_i32_1 = arith.constant 0 : i32
    return %c0_i32, %c0_i32_0 : i32, i32
  }
  func.func @transform_13(%arg0: i32, %arg1: i32) -> (i32, i32) {
    %0 = arith.muli %arg1, %arg0 : i32
    %c0_i32 = arith.constant 0 : i32
    %c0_i32_0 = arith.constant 0 : i32
    return %c0_i32, %0 : i32, i32
  }
}

</mosaic_0001>

<bundles_post_ra>
// kernel: tpu_custom_call.1
= control target key start
LH: loop header
LB: loop body
LE: loop exit
PB: predicated region body
PF: predicated region fallthrough
CT: control target
= control target key end

     0   :  { %s3080_s0 = inlined_call_operand.hbm [shape: f32[8,384], index: 0, kind: input, shape index: {}]   ;;  %s3081_s1 = inlined_call_operand.hbm [shape: f32[8,384], index: 1, kind: input, shape index: {}]   ;;  %s3082_s2 = inlined_call_operand.hbm [shape: f32[384,128], index: 2, kind: input, shape index: {}]   ;;  %s3083_s3 = inlined_call_operand.vmem [shape: f32[1,128], index: 3, kind: input, shape index: {}]   ;;  %s3084_s4 = inlined_call_operand.hbm [shape: f32[128,128], index: 4, kind: input, shape index: {}]   ;;  %s3085_s5 = inlined_call_operand.vmem [shape: f32[1,128], index: 5, kind: input, shape index: {}]   ;;  %s3086_s6 = inlined_call_operand.hbm [shape: f32[128,256], index: 6, kind: input, shape index: {}]   ;;  %s3087_s7 = inlined_call_operand.vmem [shape: f32[1,256], index: 7, kind: input, shape index: {}]   ;;  %s3088_s8 = inlined_call_operand.vmem [shape: f32[16,32], index: 8, kind: input, shape index: {}]   ;;  %s3089_s9 = inlined_call_operand.hbm [shape: f32[32,384], index: 9, kind: input, shape index: {}]   ;;  %s3090_s10 = inlined_call_operand.vmem [shape: f32[8,1], index: 10, kind: output, shape index: {0}]   ;;  %s3091_s11 = inlined_call_operand.vmem [shape: f32[8,1], index: 11, kind: output, shape index: {1}]   ;;  %s3092_s12 = inlined_call_operand.hbm [shape: f32[8,128], index: 12, kind: output, shape index: {2}]   ;;  %s3093_s13 = inlined_call_operand.hbm [shape: f32[16,384], index: 13, kind: output, shape index: {3}]  }
   0x1   :  { %3133 = sst [smem:[#allocation42_spill]] %s3080_s0 }
   0x2   :  { %3134 = sst [smem:[#allocation43_spill]] %s3081_s1 }
   0x3   :  { %3135 = sst [smem:[#allocation44_spill]] %s3083_s3 }
   0x4   :  { %3136 = sst [smem:[#allocation45_spill]] %s3084_s4 }
   0x5   :  { %3137 = sst [smem:[#allocation46_spill]] %s3085_s5 }
   0x6   :  { %3138 = sst [smem:[#allocation47_spill]] %s3086_s6 }
   0x7   :  { %3139 = sst [smem:[#allocation48_spill]] %s3087_s7 }
   0x8   :  { %3140 = sst [smem:[#allocation49_spill]] %s3088_s8 }
   0x9   :  { %3141 = sst [smem:[#allocation50_spill]] %s3090_s10 }
   0xa   :  { %3142 = sst [smem:[#allocation51_spill]] %s3091_s11 }
   0xb   :  { %3143 = sst [smem:[#allocation52_spill]] %s3092_s12 }
   0xc   :  { %3144 = sst [smem:[#allocation53_spill]] %s3093_s13 }
   0xd   :  { %19 = vsyncpa [#allocation8], 0 }
   0xe   :  { %21 = vsyncpa [#allocation8 + $0x1], 0 }
   0xf   :  { %22 = vsyncpa [#allocation11], 0 }
  0x10   :  { %24 = vsyncpa [#allocation11 + $0x1], 0 }
  0x11   :  { %25 = vsyncpa [#allocation14], 0 }
  0x12   :  { %26 = vsyncpa [#allocation17], 0 }
  0x13   :  { %28 = vsyncpa [#allocation17 + $0x1], 0 }
  0x14   :  { %29 = vsyncpa [#allocation9], 0 }
  0x15   :  { %30 = vsyncpa [#allocation20], 0 }
  0x16   :  { %32 = vsyncpa [#allocation20 + $0x1], 0  ;;  %s2428_s25 = smov 0   ;;  %s2430_s26 = smov 0  }
  0x17   :  { %s2432_s27 = smov 0   ;;  %s2434_s28 = smov 0  }
  0x18   :  { %s2436_s29 = smov 0   ;;  %s2438_s30 = smov 0  }
  0x19   :  { %s2440_s14 = smov 0   ;;  %s2442_s15 = smov 0  }
  0x1a   :  { %s2444_s16 = smov 0   ;;  %s2446_s17 = smov 0  }
  0x1b   :  { %s2448_s18 = smov 0   ;;  %s2450_s19 = smov 0  }
  0x1c   :  { %s2452_s20 = smov 0   ;;  %s2454_s21 = smov 0  }
  0x1d LB: > { %3145 = sst [smem:[#allocation27_spill]] %s2278_s26  ;;  %s2499_s22 = sadd.s32 4294967295, %s2326_s21   ;;  %s2326_s21 = sphi %s2454_s21, %s38_s21   ;;  %s2322_s20 = sphi %s2452_s20, %s3252_s20   ;;  %s2318_s19 = sphi %s2450_s19, %s3251_s19   ;;  %s2314_s18 = sphi %s2448_s18, %s3240_s18   ;;  %s2310_s17 = sphi %s2446_s17, %s3250_s17   ;;  %s2306_s16 = sphi %s2444_s16, %s3239_s16   ;;  %s2302_s15 = sphi %s2442_s15, %s3249_s15   ;;  %s2298_s14 = sphi %s2440_s14, %s3248_s14   ;;  %s2294_s30 = sphi %s2438_s30, %s3247_s30   ;;  %s2290_s29 = sphi %s2436_s29, %s3246_s29   ;;  %s2286_s28 = sphi %s2434_s28, %s3236_s28   ;;  %s2282_s27 = sphi %s2432_s27, %s3245_s27   ;;  %s2278_s26 = sphi %s2430_s26, %s3244_s26   ;;  %s2274_s25 = sphi %s2428_s25, %s3243_s25  }
  0x1e   : > { %3146 = sst [smem:[#allocation28_spill]] %s2290_s29  ;;  %p1484_p0 = scmp.ge.s32.totalorder %s2326_s21, 1 }
  0x1f   : > { %3147 = sst [smem:[#allocation29_spill]] %s2306_s16  ;;  %p3097_p1 = scmp.eq.s32.totalorder %s2499_s22, 0 }
  0x20   : > { %3148 = sst [smem:[#allocation30_spill]] %s2310_s17  ;;  %p386_p2 = scmp.lt.s32.totalorder %s2326_s21, 7 }
  0x21   : > { %3149 = sst [smem:[#allocation31_spill]] %s2314_s18  ;;  %s2328_s24 = smov [#allocation13]  }
  0x22   : > { %3150 = sst [smem:[#allocation32_spill]] %s2322_s20  ;;  %p2504_p3 = pnand %p1484_p0, %p386_p2 }
  0x23   : > { %3151 = sst [smem:[#allocation33_spill]] %s2499_s22  ;;  %s401_s13 = sshll.u32 %s2328_s24, 4  ;;  %s402_s13 = int_to_ptr.vmem [resolvable:$true] %s401_s13 }
  0x24   : > { %s3152_s23 = scalar_select %p2504_p3, 1, 0 }
  0x25   : > { %p1765_p4 = pneg %p2504_p3  ;;  %s3155_s4 = sld [smem:[#allocation45_spill]] }
  0x26   : > { %3153 = sst [smem:[#allocation34_spill]] %s3152_s23 }
  0x27   : > { %p2512_p5 = pnand %p1765_p4, %p3097_p1 }
  0x29   : > { %p3111_p7 = pneg %p2512_p5 }
  0x2b   : > { %s1962_s7 = scalar_lea.hbm %s3155_s4, 2048 }
  0x2c   : > { %p1963_p6 = scmp.ne.s32.totalorder %s3155_s4, %s1962_s7  ;;  %p1969_p10 = scmp.lt.u32.totalorder %s1962_s7, %s3155_s4 }
  0x2e   : > { %p1965_p8 = pnand %p3111_p7, %p1963_p6 }
  0x30   : > { %p1966_p9 = pneg %p1965_p8 }
  0x32   : > { %p1971_p11 = pnand %p1969_p10, %p1966_p9 }
  0x34   : > { %1974 = shalt.err (!%p1971_p11)
}
  0x35   : > { %s1975_s10 = scalar_lea.vmem %s402_s13, 2048  ;;  %p1983_p2 = scmp.lt.s32.totalorder %s402_s13, %s402_s13 }
  0x36   : > { %p1976_p12 = scmp.ne.s32.totalorder %s402_s13, %s1975_s10  ;;  %p1984_p4 = scmp.lt.s32.totalorder %s1975_s10, %s1975_s10 }
  0x38   : > { %p1978_p13 = pnand %p1976_p12, %p3111_p7  ;;  %p1985_p1 = por %p1984_p4, %p1983_p2 }
  0x3a   : > { %p1979_p0 = pneg %p1978_p13 }
  0x3c   : > { %p1986_p3 = pnand %p1985_p1, %p1979_p0 }
  0x3e   : > { %1989 = shalt.err (!%p1986_p3)
}
  0x3f   : > { %s3100_s3 = smov 128   ;;  %s3102_s5 = smov 8  }
  0x40   : > { %1768 = dma.hbm_to_vmem [thread:$0]  (!%p2512_p5), %s3155_s4, 2048, %s402_s13, [#allocation14], %s3100_s3, %s3100_s3, %s3102_s5  }
  0x41   : > { %p3110_p1 = scmp.eq.s32.totalorder %s2326_s21, 0  ;;  %s82_s11 = ssub.s32 1, %s2322_s20 }
  0x42   : > { %s2545_s10 = smul.u32 %s2318_s19, %s82_s11  ;;  %p96_p3 = scmp.ne.s32.totalorder %s2294_s30, %s2290_s29 }
  0x43   : > { %p102_p6 = scmp.ne.s32.totalorder %s2290_s29, %s2286_s28  ;;  %p278_p8 = scmp.ne.s32.totalorder %s2282_s27, %s2278_s26 }
  0x44   : > { %p2555_p9 = por %p96_p3, %p3110_p1  ;;  %p284_p10 = scmp.ne.s32.totalorder %s2278_s26, %s2274_s25 }
  0x45   : > { %p3157_p11 = scmp.eq.s32.totalorder %s2499_s22, 0  ;;  %p2569_p13 = por %p278_p8, %p3110_p1 }
  0x46   : > { %p3109_p4 = scmp.lt.s32.totalorder %s2326_s21, 6  ;;  %s456_s8 = sand.u32 1, %s2326_s21  }
  0x47   : > { %p2563_p12 = por %p102_p6, %p3157_p11  ;;  %p3161_p0 = pmov %p3157_p11 }
  0x48   : > { %s458_s11 = sand.u32 1, %s2294_s30   ;;  %s1491_s3 = sshll.u32 %s2545_s10, 7 }
  0x49   : > { %s3158_s13 = scalar_select %p2563_p12, 1, 0 }
  0x4a   : > { %p2575_p2 = por %p284_p10, %p3161_p0  ;;  %s1490_s25 = sshll.u32 %s458_s11, 3 }
  0x4b   : > { %3159 = sst [smem:[#allocation35_spill]] %s3158_s13  ;;  %s3164_s1 = sld [smem:[#allocation43_spill]] }
  0x4c   : > { %s3162_s28 = scalar_select %p2575_p2, 1, 0 }
  0x4d   : > { %s460_s18 = scalar_lea.vmem [#allocation10], %s1490_s25  ;;  %p2594_p3 = pnand %p3109_p4, %p2555_p9 }
  0x4e   : > { %3163 = sst [smem:[#allocation36_spill]] %s3162_s28  ;;  %s469_s26 = sshll.u32 %s460_s18, 4  ;;  %s2588_s26 = int_to_ptr.vmem [resolvable:$true] %s469_s26 }
  0x4f   : > { %s3165_s28 = scalar_select %p2594_p3, 1, 0 }
  0x50   : > { %s2598_s13 = sshll.u32 %s458_s11, 7  ;;  %p2604_p6 = pnand %p3109_p4, %p2569_p13 }
  0x51   : > { %s2586_s4 = scalar_lea.hbm %s3164_s1, %s1491_s3  ;;  %s2608_s5 = scalar_lea.sflag [#allocation11], %s456_s8 }
  0x52   : > { %s3166_s3 = scalar_select %p2604_p6, 1, 0 }
  0x53   : > { %s1990_s18 = scalar_lea.hbm %s2586_s4, 128  ;;  %p3116_p10 = pneg %p2594_p3 }
  0x54   : > { %p1991_p8 = scmp.ne.s32.totalorder %s2586_s4, %s1990_s18  ;;  %s1995_s11 = scalar_lea.hbm %s3164_s1, 384 }
  0x55   : > { %p1996_p13 = scmp.lt.u32.totalorder %s2586_s4, %s3164_s1  ;;  %p1997_p0 = scmp.lt.u32.totalorder %s1995_s11, %s1990_s18 }
  0x56   : > { %p1993_p9 = pnand %p3116_p10, %p1991_p8  ;;  %p1999_p1 = scmp.lt.u32.totalorder %s1990_s18, %s2586_s4 }
  0x57   : > { %p1998_p4 = por %p1997_p0, %p1996_p13 }
  0x58   : > { %p1994_p11 = pneg %p1993_p9 }
  0x59   : > { %p2000_p7 = por %p1999_p1, %p1998_p4 }
  0x5b   : > { %p2001_p2 = pnand %p2000_p7, %p1994_p11 }
  0x5d   : > { %2004 = shalt.err (!%p2001_p2)
}
  0x5e   : > { %s2005_s8 = scalar_lea.vmem %s2588_s26, 128  ;;  %s2331_s17 = smov [#allocation10]  }
  0x5f   : > { %p2006_p8 = scmp.ne.s32.totalorder %s2588_s26, %s2005_s8  ;;  %s2010_s24 = sshll.u32 %s2331_s17, 4  ;;  %s2011_s24 = int_to_ptr.vmem [resolvable:$false] %s2010_s24 }
  0x60   : > { %s2012_s7 = scalar_lea.vmem %s2011_s24, 256  ;;  %p2013_p6 = scmp.lt.s32.totalorder %s2588_s26, %s2011_s24 }
  0x61   : > { %p2008_p9 = pnand %p2006_p8, %p3116_p10  ;;  %p2014_p13 = scmp.lt.s32.totalorder %s2012_s7, %s2005_s8 }
  0x63   : > { %p2009_p12 = pneg %p2008_p9  ;;  %p2015_p0 = por %p2014_p13, %p2013_p6 }
  0x65   : > { %p2016_p1 = pnand %p2015_p0, %p2009_p12 }
  0x67   : > { %2019 = shalt.err (!%p2016_p1)
}
  0x68   : > { %1778 = dma.hbm_to_vmem [thread:$0]  (!%p2594_p3), %s2586_s4, 128, %s2588_s26, %s2608_s5  }
  0x69   : > { %s480_s18 = scalar_lea.vmem [#allocation12], %s2598_s13  ;;  %s2332_s25 = smov [#allocation15]  }
  0x6a   : > { %s489_s11 = sshll.u32 %s480_s18, 4  ;;  %s417_s17 = sshll.u32 %s2332_s25, 4  ;;  %s2637_s11 = int_to_ptr.vmem [resolvable:$true] %s489_s11  ;;  %s418_s17 = int_to_ptr.vmem [resolvable:$true] %s417_s17 }
  0x6b   : > { %s3167_s6 = sld [smem:[#allocation47_spill]]  ;;  %p3168_p12 = pneg %p2512_p5 }
  0x71   : > { %s2020_s7 = scalar_lea.hbm %s3167_s6, 4096 }
  0x72   : > { %p2021_p7 = scmp.ne.s32.totalorder %s3167_s6, %s2020_s7  ;;  %p2027_p6 = scmp.lt.u32.totalorder %s2020_s7, %s3167_s6 }
  0x74   : > { %p2023_p2 = pnand %p2021_p7, %p3168_p12 }
  0x76   : > { %p2024_p4 = pneg %p2023_p2 }
  0x78   : > { %p2029_p11 = pnand %p2027_p6, %p2024_p4 }
  0x7a   : > { %2032 = shalt.err (!%p2029_p11)
}
  0x7b   : > { %s2033_s13 = scalar_lea.vmem %s418_s17, 4096  ;;  %p3169_p9 = pmov %p3168_p12 }
  0x7c   : > { %p2034_p8 = scmp.ne.s32.totalorder %s418_s17, %s2033_s13  ;;  %p2041_p1 = scmp.lt.s32.totalorder %s418_s17, %s418_s17 }
  0x7d   : > { %p2042_p10 = scmp.lt.s32.totalorder %s2033_s13, %s2033_s13 }
  0x7e   : > { %p2036_p13 = pnand %p2034_p8, %p3169_p9 }
  0x7f   : > { %p2043_p3 = por %p2042_p10, %p2041_p1 }
  0x80   : > { %p2037_p0 = pneg %p2036_p13 }
  0x82   : > { %p2044_p7 = pnand %p2043_p3, %p2037_p0 }
  0x84   : > { %2047 = shalt.err (!%p2044_p7)
}
  0x85   : > { %s2333_s1 = smov 256   ;;  %s2334_s29 = smov 16  }
  0x86   : > { %1771 = dma.hbm_to_vmem [thread:$0]  (!%p2512_p5), %s3167_s6, 4096, %s418_s17, [#allocation14], %s2333_s1, %s2333_s1, %s2334_s29  }
  0x87   : > { %s1483_s24 = sadd.s32 4294967294, %s2326_s21   ;;  %s47_s8 = sadd.s32 1, %s2318_s19 }
  0x88   : > { %p48_p3 = scmp.ge.s32.totalorder %s47_s8, 3  ;;  %s50_s7 = sadd.s32 1, %s2322_s20 }
  0x89   : > { %s2664_s4 = smul.u32 %s2318_s19, %s2322_s20  ;;  %s59_s26 = sadd.s32 1, %s2306_s16 }
  0x8a   : > { %s3254_s8 = smov (%p48_p3, %s47_s8), 0  ;;  %s3256_s7 = smov (!%p48_p3, %s50_s7), %s2322_s20 }
  0x8b   : > { %3170 = sst [smem:[#allocation37_spill]] %s3254_s8  ;;  %p66_p10 = scmp.ne.s32.totalorder %s2306_s16, %s2302_s15 }
  0x8c   : > { %p72_p12 = scmp.ne.s32.totalorder %s2302_s15, %s2298_s14  ;;  %p52_p5 = scmp.ge.s32.totalorder %s3256_s7, 2 }
  0x8d   : > { %s268_s12 = ssub.s32 %s2318_s19, %s3254_s8  ;;  %p3171_p2 = scmp.eq.s32.totalorder %s2326_s21, 0 }
  0x8e   : > { %p3173_p6 = scmp.eq.s32.totalorder %s2499_s22, 0  ;;  %s3258_s7 = smov (%p52_p5, %s3256_s7), 0 }
  0x8f   : > { %p2681_p4 = por %p3171_p2, %p66_p10  ;;  %3176 = sst [smem:[#allocation39_spill]] %s3258_s7 }
  0x90   : > { %p2690_p11 = por %p3173_p6, %p72_p12  ;;  %p2696_p8 = scmp.eq.s32.totalorder %s268_s12, 0 }
  0x91   : > { %s271_s29 = sadd.s32 1, %s2282_s27  ;;  %s55_s18 = smul.u32 %s3258_s7, %s3254_s8 }
  0x92   : > { %s3174_s13 = scalar_select %p2690_p11, 1, 0 }
  0x93   : > { %s84_s25 = ssub.s32 1, %s3258_s7  ;;  %p3131_p9 = scmp.eq.s32.totalorder %s2499_s22, 5 }
  0x94   : > { %3175 = sst [smem:[#allocation38_spill]] %s3174_s13  ;;  %s85_s6 = smul.u32 %s84_s25, %s3254_s8 }
  0x95   : > { %s56_s20 = ssub.s32 %s2664_s4, %s55_s18  ;;  %p379_p13 = scmp.eq.s32.totalorder %s1483_s24, 5 }
  0x96   : > { %p57_p0 = scmp.eq.s32.totalorder %s56_s20, 0  ;;  %s86_s13 = ssub.s32 %s2545_s10, %s85_s6 }
  0x97   : > { %p87_p1 = scmp.eq.s32.totalorder %s86_s13, 0  ;;  %p2713_p7 = por %p3131_p9, %p66_p10 }
  0x98   : > { %s2718_s23 = scalar_select %p57_p0, %s2306_s16, %s59_s26  }
  0x99   : > { %s3178_s12 = scalar_select %p2713_p7, 1, 0 }
  0x9a   : > { %3180 = sst [smem:[#allocation41_spill]] %s2718_s23  ;;  %s3181_s7 = sadd.s32 1, %s2294_s30 }
  0x9b   : > { %3179 = sst [smem:[#allocation40_spill]] %s3178_s12  ;;  %p2733_p3 = por %p379_p13, %p72_p12 }
  0x9c   : > { %s2723_s25 = scalar_select %p87_p1, %s2294_s30, %s3181_s7  }
  0x9d   : > { %s2728_s24 = scalar_select %p2696_p8, %s2282_s27, %s271_s29  }
  0x9e   : > { %s3182_s20 = scalar_select %p2733_p3, 1, 0 }
  0x9f   : > { %s437_s6 = sand.u32 1, %s2306_s16   ;;  %s1489_s18 = sshll.u32 %s2664_s4, 7 }
  0xa0   : > { %s1488_s13 = sshll.u32 %s437_s6, 3  ;;  %s3183_s0 = sld [smem:[#allocation42_spill]] }
  0xa1   : > { %s441_s7 = scalar_lea.vmem [#allocation7], %s1488_s13  ;;  %p3184_p10 = scmp.lt.s32.totalorder %s2326_s21, 6 }
  0xa2   : > { %s449_s26 = sshll.u32 %s441_s7, 4  ;;  %s1520_s4 = sshll.u32 %s2545_s10, 11  ;;  %s2744_s26 = int_to_ptr.vmem [resolvable:$true] %s449_s26 }
  0xa3   : > { %p2750_p12 = pnand %p3184_p10, %p2681_p4  ;;  %s438_s13 = scalar_lea.sflag [#allocation8], %s437_s6 }
  0xa5   : > { %p2050_p2 = pneg %p2750_p12 }
  0xa6   : > { %s2742_s12 = scalar_lea.hbm %s3183_s0, %s1489_s18  ;;  %s2759_s18 = scalar_lea.hbm %s3082_s2, %s1520_s4 }
  0xa7   : > { %s2048_s7 = scalar_lea.hbm %s2742_s12, 128  ;;  %s2053_s16 = scalar_lea.hbm %s3183_s0, 384 }
  0xa8   : > { %p2049_p5 = scmp.ne.s32.totalorder %s2742_s12, %s2048_s7  ;;  %p2054_p8 = scmp.lt.u32.totalorder %s2742_s12, %s3183_s0 }
  0xa9   : > { %p2055_p13 = scmp.lt.u32.totalorder %s2053_s16, %s2048_s7  ;;  %p2057_p1 = scmp.lt.u32.totalorder %s2048_s7, %s2742_s12 }
  0xaa   : > { %p2051_p4 = pnand %p2050_p2, %p2049_p5 }
  0xab   : > { %p2056_p0 = por %p2055_p13, %p2054_p8 }
  0xac   : > { %p2052_p6 = pneg %p2051_p4 }
  0xad   : > { %p2058_p10 = por %p2057_p1, %p2056_p0 }
  0xaf   : > { %p2059_p9 = pnand %p2058_p10, %p2052_p6 }
  0xb1   : > { %2062 = shalt.err (!%p2059_p9)
}
  0xb2   : > { %s2063_s6 = scalar_lea.vmem %s2744_s26, 128  ;;  %s2335_s23 = smov [#allocation7]  }
  0xb3   : > { %p2064_p5 = scmp.ne.s32.totalorder %s2744_s26, %s2063_s6  ;;  %s2068_s4 = sshll.u32 %s2335_s23, 4  ;;  %s2069_s4 = int_to_ptr.vmem [resolvable:$false] %s2068_s4 }
  0xb4   : > { %s2070_s22 = scalar_lea.vmem %s2069_s4, 256  ;;  %p2071_p7 = scmp.lt.s32.totalorder %s2744_s26, %s2069_s4 }
  0xb5   : > { %p2066_p4 = pnand %p2064_p5, %p2050_p2  ;;  %p2072_p8 = scmp.lt.s32.totalorder %s2070_s22, %s2063_s6 }
  0xb7   : > { %p2067_p3 = pneg %p2066_p4  ;;  %p2073_p13 = por %p2072_p8, %p2071_p7 }
  0xb9   : > { %p2074_p0 = pnand %p2073_p13, %p2067_p3 }
  0xbb   : > { %2077 = shalt.err (!%p2074_p0)
}
  0xbc   : > { %1775 = dma.hbm_to_vmem [thread:$0]  (!%p2750_p12), %s2742_s12, 128, %s2744_s26, %s438_s13  }
  0xbd   : > { %s2078_s16 = scalar_lea.hbm %s2759_s18, 2048  ;;  %p3186_p2 = scmp.ne.s32.totalorder %s3165_s28, 0 }
  0xbe   : > { %p2079_p9 = scmp.ne.s32.totalorder %s2759_s18, %s2078_s16  ;;  %s2083_s7 = scalar_lea.hbm %s3082_s2, 6144 }
  0xbf   : > { %p3187_p6 = pneg %p3186_p2  ;;  %p2084_p7 = scmp.lt.u32.totalorder %s2759_s18, %s3082_s2 }
  0xc0   : > { %p2085_p3 = scmp.lt.u32.totalorder %s2083_s7, %s2078_s16  ;;  %p2087_p4 = scmp.lt.u32.totalorder %s2078_s16, %s2759_s18 }
  0xc1   : > { %p2081_p1 = pnand %p2079_p9, %p3187_p6 }
  0xc2   : > { %p2086_p5 = por %p2085_p3, %p2084_p7 }
  0xc3   : > { %p2082_p10 = pneg %p2081_p1 }
  0xc4   : > { %p2088_p8 = por %p2087_p4, %p2086_p5 }
  0xc6   : > { %p2089_p13 = pnand %p2088_p8, %p2082_p10 }
  0xc8   : > { %2092 = shalt.err (!%p2089_p13)
}
  0xc9   : > { %s2093_s12 = scalar_lea.vmem %s2637_s11, 2048  ;;  %p3188_p0 = pmov %p3187_p6 }
  0xca   : > { %p2094_p12 = scmp.ne.s32.totalorder %s2637_s11, %s2093_s12  ;;  %s2336_s26 = smov [#allocation12]  }
  0xcb   : > { %s2098_s13 = sshll.u32 %s2336_s26, 4  ;;  %s2099_s13 = int_to_ptr.vmem [resolvable:$false] %s2098_s13 }
  0xcc   : > { %p2096_p9 = pnand %p2094_p12, %p3188_p0  ;;  %s2100_s10 = scalar_lea.vmem %s2099_s13, 4096 }
  0xcd   : > { %p2101_p1 = scmp.lt.s32.totalorder %s2637_s11, %s2099_s13  ;;  %p2102_p7 = scmp.lt.s32.totalorder %s2100_s10, %s2093_s12 }
  0xce   : > { %p2097_p6 = pneg %p2096_p9 }
  0xcf   : > { %p2103_p3 = por %p2102_p7, %p2101_p1 }
  0xd1   : > { %p2104_p5 = pnand %p2103_p3, %p2097_p6 }
  0xd3   : > { %2107 = shalt.err (!%p2104_p5)
}
  0xd4   : > { %s3189_s6 = smov 8   ;;  %s3190_s23 = smov 128  }
  0xd5   : > { %1781 = dma.hbm_to_vmem [thread:$0]  (!%p3186_p2), %s2759_s18, 2048, %s2637_s11, %s2608_s5, %s3190_s23, %s3190_s23, %s3189_s6  }
  0xd6   : > { %s3191_s4 = sand.u32 1, %s2282_s27   ;;  %s1496_s16 = sshll.u32 %s2318_s19, 7 }
  0xd7   : > { %s1495_s22 = sshll.u32 %s3191_s4, 5  ;;  %s2819_s7 = scalar_lea.hbm %s3089_s9, %s1496_s16 }
  0xd8   : > { %s503_s28 = scalar_lea.vmem [#allocation16], %s1495_s22  ;;  %s3192_s1 = smov %s3191_s4 }
  0xd9   : > { %s509_s17 = sshll.u32 %s503_s28, 4  ;;  %s2825_s12 = scalar_lea.sflag [#allocation17], %s3192_s1  ;;  %s2821_s17 = int_to_ptr.vmem [resolvable:$true] %s509_s17 }
  0xda   : > { %s2108_s5 = scalar_lea.hbm %s2819_s7, 512  ;;  %p3193_p10 = scmp.ne.s32.totalorder %s3166_s3, 0 }
  0xdb   : > { %p2109_p2 = scmp.ne.s32.totalorder %s2819_s7, %s2108_s5  ;;  %s2113_s26 = scalar_lea.hbm %s3089_s9, 1536 }
  0xdc   : > { %p2110_p4 = pneg %p3193_p10  ;;  %p2114_p12 = scmp.lt.u32.totalorder %s2819_s7, %s3089_s9 }
  0xdd   : > { %p2115_p0 = scmp.lt.u32.totalorder %s2113_s26, %s2108_s5  ;;  %p2117_p6 = scmp.lt.u32.totalorder %s2108_s5, %s2819_s7 }
  0xde   : > { %p2111_p8 = pnand %p2110_p4, %p2109_p2 }
  0xdf   : > { %p2116_p9 = por %p2115_p0, %p2114_p12 }
  0xe0   : > { %p2112_p13 = pneg %p2111_p8 }
  0xe1   : > { %p2118_p1 = por %p2117_p6, %p2116_p9 }
  0xe3   : > { %p2119_p7 = pnand %p2118_p1, %p2112_p13 }
  0xe5   : > { %2122 = shalt.err (!%p2119_p7)
}
  0xe6   : > { %s2123_s4 = scalar_lea.vmem %s2821_s17, 512  ;;  %s2337_s22 = smov [#allocation16]  }
  0xe7   : > { %p2124_p3 = scmp.ne.s32.totalorder %s2821_s17, %s2123_s4  ;;  %s2128_s16 = sshll.u32 %s2337_s22, 4  ;;  %s2129_s16 = int_to_ptr.vmem [resolvable:$false] %s2128_s16 }
  0xe8   : > { %s2130_s8 = scalar_lea.vmem %s2129_s16, 1024  ;;  %p2131_p8 = scmp.lt.s32.totalorder %s2821_s17, %s2129_s16 }
  0xe9   : > { %p2126_p5 = pnand %p2124_p3, %p2110_p4  ;;  %p2132_p12 = scmp.lt.s32.totalorder %s2130_s8, %s2123_s4 }
  0xeb   : > { %p2127_p2 = pneg %p2126_p5  ;;  %p2133_p0 = por %p2132_p12, %p2131_p8 }
  0xed   : > { %p2134_p9 = pnand %p2133_p0, %p2127_p2 }
  0xef   : > { %2137 = shalt.err (!%p2134_p9)
}
  0xf0   : > { %s2338_s29 = smov 384   ;;  %s3194_s28 = sld [smem:[#allocation34_spill]] }
  0xf1   : > { %1784 = dma.hbm_to_vmem [thread:$0]  (!%p3193_p10), %s2819_s7, 512, %s2821_s17, %s2825_s12, %s2338_s29, %s3190_s23, %s3189_s6  }
  0xf6   : > { %p3195_p4 = scmp.ne.s32.totalorder %s3194_s28, 0 }
  0xf7   : > { %s2858_s5 = sand.u32 (!%p3195_p4), 1, %s2302_s15  }
  0xf8   : > { %521 = sbr.rel (%p3195_p4) target bundleno = 2364 (0x93c), region = 60  ;;  %s1498_s11 = sshll.u32 (!%p3195_p4), %s2858_s5, 3 }
  0xf9   : > { %s524_s18 = scalar_lea.sflag (!%p3195_p4), [#allocation8], %s2858_s5  ;;  %s2862_s26 = scalar_lea.vmem (!%p3195_p4), [#allocation7], %s1498_s11 }
  0xff   : > { %2249 = dma.done.wait (%p2690_p11), %s524_s18, 128  }
 0x100   : > { %2251 = vsyncadd (%p2690_p11), %s524_s18, 4294967168  ;;  %s3197_s3 = sld [smem:[#allocation33_spill]]  ;;  %s3199_s23 = sld [smem:[#allocation35_spill]] }
 0x101   : > { %s3198_s6 = sld [smem:[#allocation28_spill]] }
 0x106   : > { %s532_s7 = sand.u32 1, %s3197_s3   ;;  %p3200_p10 = scmp.ne.s32.totalorder %s3199_s23, 0 }
 0x107   : > { %s534_s17 = sand.u32 1, %s3198_s6   ;;  %s533_s13 = scalar_lea.sflag [#allocation11], %s532_s7 }
 0x108   : > { %s2870_s12 = sshll.u32 %s534_s17, 3 }
 0x109   : > { %s536_s10 = scalar_lea.vmem [#allocation10], %s2870_s12 }
 0x10a   : > { %2253 = dma.done.wait (%p3200_p10), %s533_s13, 2176  }
 0x10b   : > { %2255 = vsyncadd (%p3200_p10), %s533_s13, 4294965120  ;;  %s1500_s4 = sshll.u32 %s534_s17, 7  ;;  %p3201_p11 = scmp.eq.s32.totalorder %s3197_s3, 0 }
 0x10c   : > { %s2877_s22 = scalar_lea.vmem [#allocation12], %s1500_s4 }
 0x10d   : > { %2257 = dma.done.wait (%p3201_p11), [#allocation14], 6144   ;;  %p3202_p13 = pmov %p3201_p11 }
 0x10e   : > { %s3203_s16 = sld [smem:[#allocation27_spill]]  ;;  %s3204_s8 = sld [smem:[#allocation36_spill]] }
 0x10f   : > { %2259 = vsyncadd (%p3202_p13), [#allocation14], 4294961152 }
 0x114   : > { %s558_s29 = sand.u32 1, %s3203_s16   ;;  %p3205_p6 = scmp.ne.s32.totalorder %s3204_s8, 0 }
 0x115   : > { %s1503_s28 = sshll.u32 %s558_s29, 5  ;;  %s559_s1 = scalar_lea.sflag [#allocation17], %s558_s29 }
 0x116   : > { %s562_s11 = scalar_lea.vmem [#allocation16], %s1503_s28 }
 0x117   : > { %2261 = dma.done.wait (%p3205_p6), %s559_s1, 512  }
 0x118   : > { %2263 = vsyncadd (%p3205_p6), %s559_s1, 4294966784  ;;  %s3206_s18 = sld [smem:[#allocation31_spill]]  ;;  %s3207_s6 = sld [smem:[#allocation30_spill]] }
 0x119   : > { %s1504_s23 = sshll.u32 %s2858_s5, 4 }
 0x11a   : > { %s2893_s3 = scalar_lea.vmem [#allocation19], %s1504_s23 }
 0x11e   : > { %p627_p1 = scmp.eq.s32.totalorder %s3206_s18, 0  ;;  %p628_p7 = scmp.eq.s32.totalorder %s3207_s6, 0 }
 0x120   : > { %p629_p3 = pnand %p628_p7, %p627_p1 }
 0x121   : > { %vm634_vm0 = vcmask (!%p629_p3), 7168   ;;  %v2339_v0 = vmov (!%p629_p3), 0.0   ;;  %v2340_v1 = vmov (!%p629_p3), -1e+30  }
 0x122   : > { %632 = sbr.rel (%p629_p3) target bundleno = 297 (0x129), region = 88  ;;  %633 = vst [vmem:[#allocation2] sm:$0xff] (!%p629_p3), %v2339_v0  ;;  %639 = vst [vmem:[#allocation6] sm:$0xff] (!%p629_p3), %v2339_v0 }
 0x123   : > { %635 = vst.msk [vmem:[#allocation4] sm:$0xff] (!%p629_p3), %vm634_vm0, %v2340_v1  ;;  %636 = vst.msk [vmem:[#allocation4 + $0x8] sm:$0xff] (!%p629_p3), %vm634_vm0, %v2340_v1 }
 0x124   : > { %637 = vst.msk [vmem:[#allocation5] sm:$0xff] (!%p629_p3), %vm634_vm0, %v2339_v0  ;;  %638 = vst.msk [vmem:[#allocation5 + $0x8] sm:$0xff] (!%p629_p3), %vm634_vm0, %v2339_v0 }
 0x129 PF: > { %v642_v2 = vld [vmem:[%s562_s11] sm:$0xff]  ;;  %s3208_s7 = sld [smem:[#allocation30_spill]]  ;;  %v643_v3 = vld [vmem:[%s562_s11 + $0x8] sm:$0xff]  ;;  %v644_v4 = vld [vmem:[%s562_s11 + $0x10] sm:$0xff]  ;;  %vm653_vm1 = vcmask 261120   ;;  %s3209_s4 = sld [smem:[#allocation49_spill]]  ;;  %v647_v10 = vlaneseq }
 0x12a   : > { %v1652_v5 = vpack.c.bf16 %v643_v3, %v642_v2  ;;  %v645_v6 = vld [vmem:[%s562_s11 + $0x18] sm:$0xff]  ;;  %v2341_v14 = vmov -1e+30   ;;  %s3210_s28 = sld [smem:[#allocation31_spill]] }
 0x12b   : > { %v1656_v8 = vpack.c.bf16 %v645_v6, %v644_v4  ;;  %v2903_v11 = vand.u32 127, %v647_v10 }
 0x12c   : > { %1653 = vmatprep.subr.bf16.mxu0 %v1652_v5 }
 0x12d   : > { %1655 = vmatpush3.bf16.msra.mxu0 %v1652_v5 }
 0x12e   : > { %1657 = vmatprep.subr.bf16.mxu0 %v1656_v8 }
 0x12f   : > { %v640_v7 = vld [vmem:[%s3209_s4] sm:$0xff]  ;;  %v641_v9 = vld [vmem:[%s3209_s4 + $0x8] sm:$0xff]  ;;  %s1505_s29 = sshll.u32 %s3208_s7, 7 }
 0x130   : > { %1572 = vmatprep.mubr.msk.f32.mxu0 %vm653_vm1, %v640_v7  ;;  %v649_v12 = vstv %s1505_s29  ;;  %p1508_p5 = scmp.ne.s32.totalorder %s3210_s28, 0 }
 0x131   : > { %1659 = vmatpush3.bf16.msra.mxu0 %v1656_v8  ;;  %v650_v13 = vadd.s32 %v649_v12, %v2903_v11  ;;  %v2342_v20 = vmov (!%p1508_p5), 0   ;;  %v740_v21 = vld [vmem:[%s2877_s22] sm:$0xff] (!%p1508_p5)  ;;  %v741_v22 = vld [vmem:[%s2877_s22 + $0x8] sm:$0xff] (!%p1508_p5)  ;;  %v742_v23 = vld [vmem:[%s2877_s22 + $0x10] sm:$0xff] (!%p1508_p5)  ;;  %v2343_v24 = vmov (!%p1508_p5), 0.0|0.0   ;;  %vm2344_vm3 = vmmov (!%p1508_p5), 0  }
 0x132   : > { %1934 = vset.pattern.permute.xlu1 (!%p1508_p5), %v2342_v20  ;;  %1935 = vset.pattern.permute.xlu0 (!%p1508_p5), %v2342_v20  ;;  %v1661_v25 = vpack.c.bf16 (!%p1508_p5), %v741_v22, %v740_v21  ;;  %v743_v26 = vld [vmem:[%s2877_s22 + $0x18] sm:$0xff] (!%p1508_p5)  ;;  %v2345_v27 = vmov (!%p1508_p5), 0.0   ;;  %v744_v29 = vld [vmem:[%s2877_s22 + $0x20] sm:$0xff] (!%p1508_p5)  ;;  %v745_v30 = vld [vmem:[%s2877_s22 + $0x28] sm:$0xff] (!%p1508_p5)  ;;  %vm868_vm4 = vcmask (!%p1508_p5), 7168  }
 0x133   : > { %vm651_vm2 = vcmp.lt.s32.totalorder %v650_v13, 320  ;;  %1660 = vmatprep.subr.bf16.mxu0 (!%p1508_p5), %v2343_v24  ;;  %v1664_v28 = vpack.c.bf16 (!%p1508_p5), %v743_v26, %v742_v23  ;;  %v1667_v31 = vpack.c.bf16 (!%p1508_p5), %v745_v30, %v744_v29  ;;  %v746_v32 = vld [vmem:[%s2877_s22 + $0x30] sm:$0xff] (!%p1508_p5)  ;;  %v747_v33 = vld [vmem:[%s2877_s22 + $0x38] sm:$0xff] (!%p1508_p5)  ;;  %v748_v35 = vld [vmem:[%s2877_s22 + $0x40] sm:$0xff] (!%p1508_p5) }
 0x134   : > { %1573 = vmatmul.mubr.msk.f32.vlgmr.msra.gmra.mrb[0].mxu0 %vm653_vm1, %v641_v9  ;;  %v652_v15 = vsel %vm651_vm2, 0.0, %v2341_v14  ;;  %v1670_v34 = vpack.c.bf16 (!%p1508_p5), %v747_v33, %v746_v32  ;;  %v749_v36 = vld [vmem:[%s2877_s22 + $0x48] sm:$0xff] (!%p1508_p5)  ;;  %v750_v38 = vld [vmem:[%s2877_s22 + $0x50] sm:$0xff] (!%p1508_p5)  ;;  %v751_v39 = vld [vmem:[%s2877_s22 + $0x58] sm:$0xff] (!%p1508_p5) }
 0x135   : > { %1607 = vmatprep.mubr.msk.f32.mxu0 (!%p1508_p5), %vm2344_vm3, %v2345_v27  ;;  %1662 = vmatpush3.bf16.msra.mxu0 (!%p1508_p5), %v1661_v25  ;;  %v1673_v37 = vpack.c.bf16 (!%p1508_p5), %v749_v36, %v748_v35  ;;  %v1676_v40 = vpack.c.bf16 (!%p1508_p5), %v751_v39, %v750_v38  ;;  %v752_v41 = vld [vmem:[%s2877_s22 + $0x60] sm:$0xff] (!%p1508_p5)  ;;  %v753_v42 = vld [vmem:[%s2877_s22 + $0x68] sm:$0xff] (!%p1508_p5)  ;;  %v754_v44 = vld [vmem:[%s2877_s22 + $0x70] sm:$0xff] (!%p1508_p5) }
 0x136   : > { %1663 = vmatprep.subr.bf16.mxu0 (!%p1508_p5), %v2343_v24  ;;  %v1679_v43 = vpack.c.bf16 (!%p1508_p5), %v753_v42, %v752_v41  ;;  %v755_v45 = vld [vmem:[%s2877_s22 + $0x78] sm:$0xff] (!%p1508_p5)  ;;  %v829_v51 = vld [vmem:[#allocation4 + $0x8] sm:$0xff] (!%p1508_p5)  ;;  %v738_v0 = vld [vmem:[#allocation2] sm:$0xff] (!%p1508_p5) }
 0x137   : > { %v1682_v46 = vpack.c.bf16 (!%p1508_p5), %v755_v45, %v754_v44  ;;  %v739_v47 = vld [vmem:[%s536_s10] sm:$0xff] (!%p1508_p5)  ;;  %v836_v7 = vld [vmem:[#allocation5] sm:$0xff] (!%p1508_p5) }
 0x138   : > { %v828_v48 = vld [vmem:[#allocation4] sm:$0xff] (!%p1508_p5)  ;;  %v837_v13 = vld [vmem:[#allocation5 + $0x8] sm:$0xff] (!%p1508_p5) }
 0x139   : > { %1665 = vmatpush3.bf16.msra.mxu0 (!%p1508_p5), %v1664_v28 }
 0x13a   : > { %1666 = vmatprep.subr.bf16.mxu0 (!%p1508_p5), %v2343_v24 }
 0x13d   : > { %1668 = vmatpush3.bf16.msra.mxu0 (!%p1508_p5), %v1667_v31 }
 0x13e   : > { %1669 = vmatprep.subr.bf16.mxu0 (!%p1508_p5), %v2343_v24 }
 0x141   : > { %1671 = vmatpush3.bf16.msra.mxu0 (!%p1508_p5), %v1670_v34 }
 0x142   : > { %1672 = vmatprep.subr.bf16.mxu0 (!%p1508_p5), %v2343_v24 }
 0x145   : > { %1674 = vmatpush3.bf16.msra.mxu0 (!%p1508_p5), %v1673_v37 }
 0x146   : > { %1675 = vmatprep.subr.bf16.mxu0 (!%p1508_p5), %v2343_v24 }
 0x149   : > { %1677 = vmatpush3.bf16.msra.mxu0 (!%p1508_p5), %v1676_v40 }
 0x14a   : > { %1678 = vmatprep.subr.bf16.mxu0 (!%p1508_p5), %v2343_v24 }
 0x14d   : > { %1680 = vmatpush3.bf16.msra.mxu0 (!%p1508_p5), %v1679_v43 }
 0x14e   : > { %1681 = vmatprep.subr.bf16.mxu0 (!%p1508_p5), %v2343_v24 }
 0x151   : > { %1683 = vmatpush3.bf16.msra.mxu0 (!%p1508_p5), %v1682_v46 }
 0x203   : > { %737 = sbr.rel (%p1508_p5) target bundleno = 959 (0x3bf), region = 92 }
 0x207   : > { %v1574_v16 = vpop.f32.mrb[0].mxu0 }
 0x208   : > { %v2906_v17 = vadd.f32 %v1574_v16, %v652_v15  ;;  %v726_v18 = vpop.f32.mrb[1].mxu0  ;;  %1608 = vmatmul.mubr.f32.vlgmr.msra.gmra.mrb[0].mxu0 (!%p1508_p5), %v739_v47 }
 0x209   : > { %v2908_v19 = vadd.f32 %v726_v18, %v652_v15 }
 0x20b   : > { %830 = vmax.xlane.f32.xlu0 %v2908_v19 }
 0x20f   : > { %832 = vmax.xlane.f32.xlu0 %v2906_v17 }
 0x298   : > { %v831_v49 = vpop.xlane.xlu0 %830 }
 0x299   : > { %v834_v50 = vmax.f32 %v828_v48, %v831_v49 }
 0x29b   : > { %v838_v52 = vsub.f32 %v828_v48, %v834_v50  ;;  %871 = vst.msk [vmem:[#allocation4] sm:$0xff] %vm868_vm4, %v834_v50  ;;  %848 = vperm.xlu1 %1934, %v834_v50  }
 0x29c   : > { %v833_v53 = vpop.xlane.xlu0 %832 }
 0x29d   : > { %v835_v54 = vmax.f32 %v829_v51, %v833_v53  ;;  %v840_v4 = vmul.f32 1.442695, %v838_v52 }
 0x29f   : > { %v839_v55 = vsub.f32 %v829_v51, %v835_v54  ;;  %872 = vst.msk [vmem:[#allocation4 + $0x8] sm:$0xff] %vm868_vm4, %v835_v54  ;;  %853 = vperm.xlu1 %1934, %v835_v54  }
 0x2a1   : > { %v842_v5 = vmul.f32 1.442695, %v839_v55 }
 0x2db   : > { %v822_v1 = vpop.f32.mrb[0].mxu0 }
 0x2dc   : > { %v826_v2 = vadd.f32 %v822_v1, %v738_v0  ;;  %v1609_v3 = vpop.f32.mrb[1].mxu0 }
 0x2de   : > { %827 = vst [vmem:[#allocation2] sm:$0xff] %v826_v2 }
 0x31a   : > { %v849_v56 = vpop.permute.xlu1 %848 }
 0x31b   : > { %v856_v57 = vsub.f32 %v2908_v19, %v849_v56 }
 0x31d   : > { %v858_v58 = vmul.f32 1.442695, %v856_v57 }
 0x31e   : > { %v854_v59 = vpop.permute.xlu1 %853 }
 0x31f   : > { %1936 = vpow2.f32 %v858_v58  ;;  %v857_v60 = vsub.f32 %v2906_v17, %v854_v59 }
 0x321   : > { %v860_v61 = vmul.f32 1.442695, %v857_v60 }
 0x323   : > { %1938 = vpow2.f32 %v860_v61 }
 0x324   : > { %1940 = vpow2.f32 %v840_v4 }
 0x325   : > { %1942 = vpow2.f32 %v842_v5 }
 0x329   : > { %v1937_v62 = vpop.eup %1936 }
 0x32a   : > { %862 = vadd.xlane.f32.xlu0 %v1937_v62 }
 0x32d   : > { %v1939_v63 = vpop.eup %1938 }
 0x32e   : > { %864 = vadd.xlane.f32.xlu1 %v1939_v63  ;;  %v1941_v6 = vpop.eup %1940 }
 0x32f   : > { %v844_v8 = vmul.f32 %v1941_v6, %v836_v7  ;;  %v1943_v9 = vpop.eup %1942 }
 0x330   : > { %v845_v15 = vmul.f32 %v1943_v9, %v837_v13 }
 0x3b7   : > { %v863_v12 = vpop.xlane.xlu0 %862 }
 0x3b8   : > { %v866_v14 = vadd.f32 %v863_v12, %v844_v8 }
 0x3ba   : > { %869 = vst.msk [vmem:[#allocation5] sm:$0xff] %vm868_vm4, %v866_v14 }
 0x3bb   : > { %v865_v16 = vpop.xlane.xlu1 %864 }
 0x3bc   : > { %v867_v18 = vadd.f32 %v865_v16, %v845_v15 }
 0x3be   : > { %870 = vst.msk [vmem:[#allocation5 + $0x8] sm:$0xff] %vm868_vm4, %v867_v18 }
 0x3bf PF: > { %s3211_s12 = sld [smem:[#allocation31_spill]] }
 0x3c5   : > { %p873_p2 = scmp.eq.s32.totalorder %s3211_s12, 1 }
 0x3c7   : > { %p874_p8 = pnand %p873_p2, %p628_p7 }
 0x3c8   : > { %v888_v20 = vld [vmem:[#allocation13] sm:$0xff] (!%p874_p8)  ;;  %v889_v21 = vld [vmem:[#allocation13 + $0x8] sm:$0xff] (!%p874_p8)  ;;  %v890_v22 = vld [vmem:[#allocation13 + $0x10] sm:$0xff] (!%p874_p8)  ;;  %v2346_v23 = vmov (!%p874_p8), 0.0|0.0   ;;  %vm2347_vm5 = vmmov (!%p874_p8), 0   ;;  %v2348_v26 = vmov (!%p874_p8), 0.0  }
 0x3c9   : > { %877 = sbr.rel (%p874_p8) target bundleno = 1752 (0x6d8), region = 96  ;;  %1684 = vmatprep.subr.bf16.mxu0 (!%p874_p8), %v2346_v23  ;;  %v1685_v24 = vpack.c.bf16 (!%p874_p8), %v889_v21, %v888_v20  ;;  %v891_v25 = vld [vmem:[#allocation13 + $0x18] sm:$0xff] (!%p874_p8)  ;;  %1642 = vmatprep.mubr.msk.f32.mxu0 (!%p874_p8), %vm2347_vm5, %v2348_v26  ;;  %v892_v28 = vld [vmem:[#allocation13 + $0x20] sm:$0xff] (!%p874_p8)  ;;  %v893_v29 = vld [vmem:[#allocation13 + $0x28] sm:$0xff] (!%p874_p8)  ;;  %s3213_s11 = sld [smem:[#allocation44_spill]] (!%p874_p8)  ;;  %vm1108_vm6 = vcmp.lt.s32.totalorder (!%p874_p8), %v2903_v11, 16 }
 0x3ca   : > { %1090 = vmatprep.mubr.f32.mxu1 (!%p874_p8), %v2348_v26  ;;  %v1688_v27 = vpack.c.bf16 (!%p874_p8), %v891_v25, %v890_v22  ;;  %v894_v30 = vld [vmem:[#allocation13 + $0x30] sm:$0xff] (!%p874_p8)  ;;  %v895_v31 = vld [vmem:[#allocation13 + $0x38] sm:$0xff] (!%p874_p8)  ;;  %v983_v32 = vld [vmem:[#allocation15 + $0x8] sm:$0xff] (!%p874_p8)  ;;  %v1691_v35 = vpack.c.bf16 (!%p874_p8), %v893_v29, %v892_v28  ;;  %s3214_s23 = sld [smem:[#allocation46_spill]] (!%p874_p8)  ;;  %s3215_s13 = sld [smem:[#allocation48_spill]] (!%p874_p8)  ;;  %vm1106_vm7 = vcmask (!%p874_p8), 7168  }
 0x3cb   : > { %1686 = vmatpush3.bf16.msra.mxu0 (!%p874_p8), %v1685_v24  ;;  %v985_v33 = vld [vmem:[#allocation15 + $0x18] sm:$0xff] (!%p874_p8)  ;;  %v982_v34 = vld [vmem:[#allocation15] sm:$0xff] (!%p874_p8)  ;;  %v984_v37 = vld [vmem:[#allocation15 + $0x10] sm:$0xff] (!%p874_p8)  ;;  %v1694_v47 = vpack.c.bf16 (!%p874_p8), %v895_v31, %v894_v30  ;;  %s3216_s29 = sld [smem:[#allocation51_spill]] (!%p874_p8) }
 0x3cc   : > { %1687 = vmatprep.subr.bf16.mxu0 (!%p874_p8), %v2346_v23  ;;  %v1708_v36 = vpack.c.bf16 (!%p874_p8), %v985_v33, %v983_v32  ;;  %v987_v38 = vld [vmem:[#allocation15 + $0x28] sm:$0xff] (!%p874_p8)  ;;  %v989_v39 = vld [vmem:[#allocation15 + $0x38] sm:$0xff] (!%p874_p8)  ;;  %v1710_v40 = vpack.c.bf16 (!%p874_p8), %v984_v37, %v982_v34  ;;  %v986_v42 = vld [vmem:[#allocation15 + $0x20] sm:$0xff] (!%p874_p8) }
 0x3cd   : > { %v1712_v41 = vpack.c.bf16 (!%p874_p8), %v989_v39, %v987_v38  ;;  %v988_v43 = vld [vmem:[#allocation15 + $0x30] sm:$0xff] (!%p874_p8)  ;;  %v991_v44 = vld [vmem:[#allocation15 + $0x48] sm:$0xff] (!%p874_p8)  ;;  %v993_v45 = vld [vmem:[#allocation15 + $0x58] sm:$0xff] (!%p874_p8) }
 0x3ce   : > { %1709 = vmatprep.subr.bf16.mxu1 (!%p874_p8), %v1708_v36  ;;  %v1714_v46 = vpack.c.bf16 (!%p874_p8), %v988_v43, %v986_v42  ;;  %v896_v48 = vld [vmem:[#allocation13 + $0x40] sm:$0xff] (!%p874_p8)  ;;  %v1716_v49 = vpack.c.bf16 (!%p874_p8), %v993_v45, %v991_v44  ;;  %v992_v51 = vld [vmem:[#allocation15 + $0x50] sm:$0xff] (!%p874_p8)  ;;  %v897_v52 = vld [vmem:[#allocation13 + $0x48] sm:$0xff] (!%p874_p8)  ;;  %v1017_v43 = vshrl.u32 (!%p874_p8), %v647_v10, 7 }
 0x3cf   : > { %1689 = vmatpush3.bf16.msra.mxu0 (!%p874_p8), %v1688_v27  ;;  %1711 = vmatpush1.bf16.msra.mxu1 (!%p874_p8), %v1710_v40  ;;  %v990_v50 = vld [vmem:[#allocation15 + $0x40] sm:$0xff] (!%p874_p8)  ;;  %v995_v53 = vld [vmem:[#allocation15 + $0x68] sm:$0xff] (!%p874_p8)  ;;  %v997_v54 = vld [vmem:[#allocation15 + $0x78] sm:$0xff] (!%p874_p8)  ;;  %v1697_v56 = vpack.c.bf16 (!%p874_p8), %v897_v52, %v896_v48 }
 0x3d0   : > { %1690 = vmatprep.subr.bf16.mxu0 %v2346_v23  ;;  %1713 = vmatprep.subr.bf16.mxu1 %v1712_v41  ;;  %v1718_v55 = vpack.c.bf16 %v992_v51, %v990_v50  ;;  %v898_v57 = vld [vmem:[#allocation13 + $0x50] sm:$0xff]  ;;  %v1720_v58 = vpack.c.bf16 %v997_v54, %v995_v53  ;;  %v994_v59 = vld [vmem:[#allocation15 + $0x60] sm:$0xff]  ;;  %v899_v61 = vld [vmem:[#allocation13 + $0x58] sm:$0xff]  ;;  %v1018_v44 = vsub.s32 0, %v1017_v43 }
 0x3d1   : > { %v996_v60 = vld [vmem:[#allocation15 + $0x70] sm:$0xff]  ;;  %v999_v62 = vld [vmem:[#allocation15 + $0x88] sm:$0xff]  ;;  %v1001_v63 = vld [vmem:[#allocation15 + $0x98] sm:$0xff]  ;;  %v1700_v1 = vpack.c.bf16 %v899_v61, %v898_v57 }
 0x3d2   : > { %v1722_v0 = vpack.c.bf16 %v996_v60, %v994_v59  ;;  %v900_v2 = vld [vmem:[#allocation13 + $0x60] sm:$0xff]  ;;  %v1724_v3 = vpack.c.bf16 %v1001_v63, %v999_v62  ;;  %v1000_v5 = vld [vmem:[#allocation15 + $0x90] sm:$0xff]  ;;  %v901_v6 = vld [vmem:[#allocation13 + $0x68] sm:$0xff] }
 0x3d3   : > { %1692 = vmatpush3.bf16.msra.mxu0 %v1691_v35  ;;  %1715 = vmatpush1.bf16.msra.mxu1 %v1714_v46  ;;  %v998_v4 = vld [vmem:[#allocation15 + $0x80] sm:$0xff]  ;;  %v1003_v7 = vld [vmem:[#allocation15 + $0xa8] sm:$0xff]  ;;  %v1005_v8 = vld [vmem:[#allocation15 + $0xb8] sm:$0xff]  ;;  %v1703_v14 = vpack.c.bf16 %v901_v6, %v900_v2  ;;  %v1022_v46 = vsub.s32 1, %v1017_v43 }
 0x3d4   : > { %1693 = vmatprep.subr.bf16.mxu0 %v2346_v23  ;;  %1717 = vmatprep.subr.bf16.mxu1 %v1716_v49  ;;  %v902_v9 = vld [vmem:[#allocation13 + $0x70] sm:$0xff]  ;;  %v878_v12 = vld [vmem:[#allocation2] sm:$0xff]  ;;  %v1726_v13 = vpack.c.bf16 %v1000_v5, %v998_v4  ;;  %v1728_v16 = vpack.c.bf16 %v1005_v8, %v1003_v7  ;;  %v1002_v18 = vld [vmem:[#allocation15 + $0xa0] sm:$0xff] }
 0x3d5   : > { %v1509_v15 = vld [vmem:[%s3213_s11] ss:$0 sm:$0xff]  ;;  %v1004_v20 = vld [vmem:[#allocation15 + $0xb0] sm:$0xff]  ;;  %v903_v21 = vld [vmem:[#allocation13 + $0x78] sm:$0xff] }
 0x3d6   : > { %v1007_v22 = vld [vmem:[#allocation15 + $0xc8] sm:$0xff]  ;;  %v1009_v24 = vld [vmem:[#allocation15 + $0xd8] sm:$0xff]  ;;  %v886_v25 = vadd.f32 %v1509_v15, %v878_v12  ;;  %v1730_v26 = vpack.c.bf16 %v1004_v20, %v1002_v18  ;;  %v1706_v27 = vpack.c.bf16 %v903_v21, %v902_v9  ;;  %v1006_v29 = vld [vmem:[#allocation15 + $0xc0] sm:$0xff] }
 0x3d7   : > { %1695 = vmatpush3.bf16.msra.mxu0 %v1694_v47  ;;  %1719 = vmatpush1.bf16.msra.mxu1 %v1718_v55  ;;  %v1732_v28 = vpack.c.bf16 %v1009_v24, %v1007_v22  ;;  %v1008_v30 = vld [vmem:[#allocation15 + $0xd0] sm:$0xff]  ;;  %v1011_v33 = vld [vmem:[#allocation15 + $0xe8] sm:$0xff]  ;;  %v1013_v34 = vld [vmem:[#allocation15 + $0xf8] sm:$0xff] }
 0x3d8   : > { %1696 = vmatprep.subr.bf16.mxu0 %v2346_v23  ;;  %1721 = vmatprep.subr.bf16.mxu1 %v1720_v58  ;;  %v887_v31 = vmax.f32 %v886_v25, 0.0  ;;  %v1734_v32 = vpack.c.bf16 %v1008_v30, %v1006_v29  ;;  %v1736_v35 = vpack.c.bf16 %v1013_v34, %v1011_v33  ;;  %v1010_v36 = vld [vmem:[#allocation15 + $0xe0] sm:$0xff]  ;;  %v1012_v37 = vld [vmem:[#allocation15 + $0xf0] sm:$0xff]  ;;  %v1510_v39 = vld [vmem:[%s3214_s23] ss:$0 sm:$0xff] }
 0x3d9   : > { %v1738_v38 = vpack.c.bf16 %v1012_v37, %v1010_v36  ;;  %v1014_v45 = vld [vmem:[%s3215_s13] sm:$0x3] }
 0x3da   : > { %v1019_v47 = vrot.slane %v1014_v45, %v1018_v44  ;;  %v1023_v48 = vrot.slane %v1014_v45, %v1022_v46 }
 0x3db   : > { %1698 = vmatpush3.bf16.msra.mxu0 %v1697_v56  ;;  %1723 = vmatpush1.bf16.msra.mxu1 %v1722_v0 }
 0x3dc   : > { %1699 = vmatprep.subr.bf16.mxu0 %v2346_v23  ;;  %1725 = vmatprep.subr.bf16.mxu1 %v1724_v3 }
 0x3df   : > { %1701 = vmatpush3.bf16.msra.mxu0 %v1700_v1  ;;  %1727 = vmatpush1.bf16.msra.mxu1 %v1726_v13 }
 0x3e0   : > { %1702 = vmatprep.subr.bf16.mxu0 %v2346_v23  ;;  %1729 = vmatprep.subr.bf16.mxu1 %v1728_v16 }
 0x3e3   : > { %1704 = vmatpush3.bf16.msra.mxu0 %v1703_v14  ;;  %1731 = vmatpush1.bf16.msra.mxu1 %v1730_v26 }
 0x3e4   : > { %1705 = vmatprep.subr.bf16.mxu0 %v2346_v23  ;;  %1733 = vmatprep.subr.bf16.mxu1 %v1732_v28 }
 0x3e7   : > { %1707 = vmatpush3.bf16.msra.mxu0 %v1706_v27  ;;  %1735 = vmatpush1.bf16.msra.mxu1 %v1734_v32 }
 0x3e8   : > { %1737 = vmatprep.subr.bf16.mxu1 %v1736_v35 }
 0x3ea   : > { %1643 = vmatmul.mubr.f32.vlgmr.msra.gmra.mrb[0].mxu0 %v887_v31 }
 0x3eb   : > { %1739 = vmatpush1.bf16.msra.mxu1 %v1738_v38 }
 0x4bd   : > { %v977_v23 = vpop.f32.mrb[0].mxu0 }
 0x4be   : > { %v978_v40 = vadd.f32 %v1510_v39, %v977_v23  ;;  %v1644_v41 = vpop.f32.mrb[1].mxu0 }
 0x4c0   : > { %v981_v42 = vmax.f32 %v978_v40, 0.0 }
 0x4c2   : > { %1091 = vmatmul.mubr.f32.vlgmr.msra.gmra.mrb[0].mxu1 %v981_v42 }
 0x595   : > { %v1092_v49 = vpop.f32.mrb[0].mxu1 }
 0x596   : > { %v1093_v50 = vadd.f32 %v1092_v49, %v1019_v47  ;;  %v1094_v51 = vpop.f32.mrb[1].mxu1 }
 0x597   : > { %v1095_v52 = vadd.f32 %v1094_v51, %v1023_v48 }
 0x598   : > { %v1098_v53 = vmul.f32 %v1093_v50, %v1093_v50  ;;  %v1109_v54 = vsel %vm1108_vm6, %v1093_v50, -1e+30 }
 0x599   : > { %v1097_v55 = vadd.f32 1.0, %v1095_v52  ;;  %v1100_v56 = vmul.f32 1.442695, %v1095_v52  ;;  %1110 = vmax.xlane.f32.xlu0 %v1109_v54 }
 0x59b   : > { %1944 = vpow2.f32 %v1100_v56  ;;  %v1099_v10 = vsub.f32 %v1097_v55, %v1098_v53 }
 0x5a5   : > { %v1945_v57 = vpop.eup %1944 }
 0x5a6   : > { %v1102_v58 = vsub.f32 %v1099_v10, %v1945_v57 }
 0x5a8   : > { %1103 = vadd.xlane.f32.xlu1 %v1102_v58 }
 0x626   : > { %v1111_v59 = vpop.xlane.xlu0 %1110 }
 0x627   : > { %v1112_v60 = vsub.f32 %v1109_v54, %v1111_v59 }
 0x629   : > { %v1113_v61 = vmul.f32 1.442695, %v1112_v60 }
 0x62b   : > { %1946 = vpow2.f32 %v1113_v61 }
 0x635   : > { %v1947_v62 = vpop.eup %1946  ;;  %v1104_v11 = vpop.xlane.xlu1 %1103 }
 0x636   : > { %v1105_v63 = vmul.f32 -0.5, %v1104_v11  ;;  %1115 = vadd.xlane.f32.xlu0 %v1947_v62 }
 0x638   : > { %1107 = vst.msk [vmem:[%s3216_s29] sm:$0xff] %vm1106_vm7, %v1105_v63 }
 0x6c3   : > { %v1116_v0 = vpop.xlane.xlu0 %1115 }
 0x6c4   : > { %1948 = vrcp.f32 %v1116_v0 }
 0x6ce   : > { %v1949_v1 = vpop.eup %1948 }
 0x6cf   : > { %v1118_v2 = vmul.f32 %v1949_v1, %v1116_v0 }
 0x6d1   : > { %v1119_v3 = vsub.f32 2.0, %v1118_v2 }
 0x6d3   : > { %v1120_v4 = vmul.f32 %v1949_v1, %v1119_v3 }
 0x6d5   : > { %v1121_v5 = vmul.f32 %v1947_v62, %v1120_v4 }
 0x6d7   : > { %1122 = vst [vmem:[#allocation3] sm:$0xff] %v1121_v5  ;;  %1123 = vst [vmem:[#allocation18] sm:$0xff] %v1121_v5 }
 0x6d8 PF: > { %s3217_s28 = sld [smem:[#allocation31_spill]] }
 0x6de   : > { %p1511_p12 = scmp.ne.s32.totalorder %s3217_s28, 1 }
 0x6df   : > { %v1127_v6 = vld [vmem:[#allocation4] sm:$0xff] (!%p1511_p12)  ;;  %v1145_v7 = vld [vmem:[#allocation5] sm:$0xff] (!%p1511_p12)  ;;  %v2349_v8 = vmov (!%p1511_p12), 0   ;;  %v1146_v9 = vld [vmem:[#allocation5 + $0x8] sm:$0xff] (!%p1511_p12)  ;;  %v2350_v24 = vmov (!%p1511_p12), 0.0|0.0   ;;  %vm2351_vm8 = vmmov (!%p1511_p12), 0  }
 0x6e0   : > { %1126 = sbr.rel (%p1511_p12) target bundleno = 2300 (0x8fc), region = 100  ;;  %1950 = vset.pattern.permute.xlu0 (!%p1511_p12), %v2349_v8  ;;  %1951 = vset.pattern.permute.xlu1 (!%p1511_p12), %v2349_v8  ;;  %1952 = vrcp.f32 (!%p1511_p12), %v1145_v7  ;;  %v1128_v12 = vld [vmem:[#allocation4 + $0x8] sm:$0xff] (!%p1511_p12)  ;;  %v2352_v25 = vmov (!%p1511_p12), 0.0   ;;  %v1169_v39 = vld [vmem:[#allocation3] sm:$0xff] (!%p1511_p12)  ;;  %vm1173_vm9 = vcmask (!%p1511_p12), 130048   ;;  %v1172_v43 = vld [vmem:[#allocation6] sm:$0xff] (!%p1511_p12) }
 0x6e1   : > { %1131 = vperm.xlu0 (!%p1511_p12), %1950, %v1127_v6   ;;  %1954 = vrcp.f32 (!%p1511_p12), %v1146_v9  ;;  %1740 = vmatprep.subr.bf16.mxu0 (!%p1511_p12), %v2350_v24  ;;  %v1249_v41 = vld [vmem:[%s2862_s26] sm:$0xff] (!%p1511_p12)  ;;  %s3218_s12 = sld [smem:[#allocation30_spill]] (!%p1511_p12) }
 0x6e2   : > { %1649 = vmatprep.mubr.msk.f32.mxu0 (!%p1511_p12), %vm2351_vm8, %v2352_v25 }
 0x6e5   : > { %1136 = vperm.xlu0 (!%p1511_p12), %1950, %v1128_v12  }
 0x6e7   : > { %p1513_p0 = scmp.ne.s32.totalorder %s3218_s12, 2 }
 0x6e8   : > { %vm1261_vm10 = vcmask (!%p1513_p0), 7168   ;;  %s3219_s1 = sld [smem:[#allocation50_spill]] (!%p1513_p0) }
 0x6ea   : > { %v1953_v13 = vpop.eup %1952 }
 0x6eb   : > { %v1955_v14 = vpop.eup %1954  ;;  %v1149_v15 = vmul.f32 %v1953_v13, %v1145_v7 }
 0x6ec   : > { %v1150_v16 = vmul.f32 %v1955_v14, %v1146_v9 }
 0x6ed   : > { %v1151_v18 = vsub.f32 2.0, %v1149_v15 }
 0x6ee   : > { %v1152_v20 = vsub.f32 2.0, %v1150_v16 }
 0x6ef   : > { %v1153_v21 = vmul.f32 %v1953_v13, %v1151_v18 }
 0x6f0   : > { %v1154_v22 = vmul.f32 %v1955_v14, %v1152_v20 }
 0x6f1   : > { %1157 = vperm.xlu1 %1951, %v1153_v21  }
 0x6f5   : > { %1162 = vperm.xlu1 %1951, %v1154_v22  }
 0x760   : > { %v1132_v26 = vpop.permute.xlu0 %1131 }
 0x761   : > { %v1139_v27 = vsub.f32 %v2908_v19, %v1132_v26 }
 0x763   : > { %v1141_v28 = vmul.f32 1.442695, %v1139_v27 }
 0x764   : > { %v1137_v29 = vpop.permute.xlu0 %1136 }
 0x765   : > { %1956 = vpow2.f32 %v1141_v28  ;;  %v1140_v30 = vsub.f32 %v2906_v17, %v1137_v29 }
 0x767   : > { %v1143_v31 = vmul.f32 1.442695, %v1140_v30 }
 0x769   : > { %1958 = vpow2.f32 %v1143_v31 }
 0x76f   : > { %v1957_v32 = vpop.eup %1956 }
 0x770   : > { %v1158_v33 = vpop.permute.xlu1 %1157 }
 0x771   : > { %v1165_v34 = vmul.f32 %v1957_v32, %v1158_v33 }
 0x773   : > { %v1959_v35 = vpop.eup %1958  ;;  %1167 = vst [vmem:[%s2893_s3] sm:$0xff] %v1165_v34 }
 0x774   : > { %v1163_v36 = vpop.permute.xlu1 %1162 }
 0x775   : > { %v1166_v37 = vmul.f32 %v1959_v35, %v1163_v36 }
 0x777   : > { %1168 = vst [vmem:[%s2893_s3 + $0x8] sm:$0xff] %v1166_v37  ;;  %v1741_v38 = vpack.c.bf16 %v1166_v37, %v1165_v34 }
 0x779   : > { %1742 = vmatpush3.bf16.msra.mxu0 %v1741_v38 }
 0x77c   : > { %1650 = vmatmul.mubr.msk.f32.vlgmr.msra.gmra.mrb[0].mxu0 %vm1173_vm9, %v1169_v39 }
 0x84f   : > { %v1243_v19 = vpop.f32.mrb[0].mxu0 }
 0x850   : > { %v1244_v23 = vadd.f32 1e-06, %v1243_v19  ;;  %v1651_v40 = vpop.f32.mrb[1].mxu0 }
 0x852   : > { %1960 = vlog2.f32 %v1244_v23 }
 0x85c   : > { %v1961_v17 = vpop.eup %1960 }
 0x85d   : > { %v1248_v42 = vmul.f32 0.6931472, %v1961_v17  ;;  %1256 = sbr.rel (%p1513_p0) target bundleno = 2300 (0x8fc), region = 104 }
 0x85f   : > { %v1250_v44 = vmul.f32 %v1249_v41, %v1248_v42 }
 0x861   : > { %v1251_v45 = vadd.f32 %v1250_v44, %v1172_v43 }
 0x863   : > { %1252 = vst [vmem:[#allocation6] sm:$0xff] %v1251_v45 }
 0x86a   : > { %v1257_v46 = vld [vmem:[#allocation6] sm:$0xff] }
 0x86b   : > { %1258 = vadd.xlane.f32.xlu0 %v1257_v46 }
 0x8f8   : > { %v1259_v47 = vpop.xlane.xlu0 %1258 }
 0x8f9   : > { %v1260_v48 = vsub.f32 0.0, %v1259_v47 }
 0x8fb   : > { %1262 = vst.msk [vmem:[%s3219_s1] sm:$0xff] %vm1261_vm10, %v1260_v48 }
 0x8fc PF: > { %s2353_s26 = smov [#allocation18]   ;;  %s3220_s11 = sld [smem:[#allocation31_spill]] }
 0x8fd   : > { %s3221_s18 = sld [smem:[#allocation30_spill]]  ;;  %s3222_s6 = sld [smem:[#allocation33_spill]] }
 0x8fe   : > { %s1281_s23 = sshll.u32 %s2353_s26, 4  ;;  %s1282_s23 = int_to_ptr.vmem [resolvable:$true] %s1281_s23 }
 0x8ff   : > { %s2138_s17 = scalar_lea.vmem %s1282_s23, 128  ;;  %p2145_p13 = scmp.lt.s32.totalorder %s1282_s23, %s1282_s23 }
 0x900   : > { %p2139_p9 = scmp.ne.s32.totalorder %s1282_s23, %s2138_s17  ;;  %p2146_p6 = scmp.lt.s32.totalorder %s2138_s17, %s2138_s17 }
 0x902   : > { %p2147_p1 = por %p2146_p6, %p2145_p13 }
 0x903   : > { %s1288_s7 = smul.u32 %s3221_s18, %s3220_s11  ;;  %p3223_p4 = scmp.eq.s32.totalorder %s3222_s6, 5 }
 0x905   : > { %p2140_p10 = pnand %p2139_p9, %p3223_p4 }
 0x907   : > { %p2141_p11 = pneg %p2140_p10 }
 0x909   : > { %p2148_p7 = pnand %p2147_p1, %p2141_p11 }
 0x90b   : > { %2151 = shalt.err (!%p2148_p7)
}
 0x90c   : > { %s3224_s8 = sld [smem:[#allocation52_spill]]  ;;  %p3225_p5 = pmov %p3223_p4 }
 0x912   : > { %s2152_s29 = scalar_lea.hbm %s3224_s8, 128 }
 0x913   : > { %p2153_p3 = scmp.ne.s32.totalorder %s3224_s8, %s2152_s29  ;;  %p2158_p12 = scmp.lt.u32.totalorder %s2152_s29, %s3224_s8 }
 0x915   : > { %p2154_p2 = pnand %p2153_p3, %p3225_p5 }
 0x917   : > { %p2155_p8 = pneg %p2154_p2 }
 0x919   : > { %p2160_p0 = pnand %p2158_p12, %p2155_p8 }
 0x91b   : > { %2163 = shalt.err (!%p2160_p0)
}
 0x91c   : > { %p3226_p9 = pmov %p3223_p4  ;;  %s3227_s11 = sld [smem:[#allocation40_spill]] }
 0x91d   : > { %s1516_s18 = sshll.u32 %s1288_s7, 7  ;;  %s1294_s17 = sshll.u32 %s2893_s3, 4  ;;  %s2998_s17 = int_to_ptr.vmem [resolvable:$true] %s1294_s17 }
 0x91e   : > { %1760 = dma.vmem_to_hbm [thread:$0]  (%p3226_p9), %s1282_s23, 128, %s3224_s8, [#allocation9]  }
 0x91f   : > { %s3228_s28 = sld [smem:[#allocation53_spill]]  ;;  %s1264_s29 = scalar_lea.sflag [#allocation20], %s2858_s5 }
 0x920   : > { %s2164_s10 = scalar_lea.vmem %s2998_s17, 256  ;;  %s2354_s22 = smov [#allocation19]  }
 0x921   : > { %p2165_p4 = scmp.ne.s32.totalorder %s2998_s17, %s2164_s10  ;;  %s2168_s23 = sshll.u32 %s2354_s22, 4  ;;  %s2169_s23 = int_to_ptr.vmem [resolvable:$false] %s2168_s23 }
 0x922   : > { %p3230_p10 = scmp.ne.s32.totalorder %s3227_s11, 0  ;;  %s2170_s3 = scalar_lea.vmem %s2169_s23, 512 }
 0x923   : > { %p2171_p6 = scmp.lt.s32.totalorder %s2998_s17, %s2169_s23  ;;  %p2172_p1 = scmp.lt.s32.totalorder %s2170_s3, %s2164_s10 }
 0x924   : > { %p2166_p11 = pnand %p2165_p4, %p3230_p10 }
 0x925   : > { %s3229_s12 = smov %s3228_s28  ;;  %s2996_s0 = scalar_lea.hbm %s3228_s28, %s1516_s18 }
 0x926   : > { %p2167_p13 = pneg %p2166_p11  ;;  %p2173_p7 = por %p2172_p1, %p2171_p6 }
 0x928   : > { %p2174_p3 = pnand %p2173_p7, %p2167_p13 }
 0x92a   : > { %2177 = shalt.err (!%p2174_p3)
}
 0x92b   : > { %s2178_s7 = scalar_lea.hbm %s2996_s0, 256  ;;  %s2182_s18 = scalar_lea.hbm %s3229_s12, 768 }
 0x92c   : > { %p2179_p5 = scmp.ne.s32.totalorder %s2996_s0, %s2178_s7  ;;  %p2183_p12 = scmp.lt.u32.totalorder %s2996_s0, %s3229_s12 }
 0x92d   : > { %p2184_p0 = scmp.lt.u32.totalorder %s2182_s18, %s2178_s7  ;;  %p2186_p4 = scmp.lt.u32.totalorder %s2178_s7, %s2996_s0 }
 0x92e   : > { %p2180_p2 = pnand %p2179_p5, %p3230_p10 }
 0x92f   : > { %p2185_p9 = por %p2184_p0, %p2183_p12 }
 0x930   : > { %p2181_p8 = pneg %p2180_p2 }
 0x931   : > { %p2187_p11 = por %p2186_p4, %p2185_p9 }
 0x933   : > { %p2188_p13 = pnand %p2187_p11, %p2181_p8 }
 0x935   : > { %2191 = shalt.err (!%p2188_p13)
}
 0x936   : > { %s2355_s28 = smov 128   ;;  %s2356_s10 = smov 384  }
 0x937   : > { %s2357_s22 = smov 8   ;;  %p3231_p6 = scmp.eq.s32.totalorder %s3222_s6, 5 }
 0x938   : > { %1761 = dma.vmem_to_hbm [thread:$0]  (%p3230_p10), %s2998_s17, 256, %s2996_s0, %s1264_s29, %s2355_s28, %s2356_s10, %s2357_s22  }
 0x939   : > { %2265 = dma.done.wait (%p3231_p6), [#allocation9], 128   ;;  %p3232_p1 = pmov %p3231_p6 }
 0x93b   : > { %2267 = vsyncadd (%p3232_p1), [#allocation9], 4294967168 }
 0x93c PF: > { %p1796_p7 = scmp.ge.s32.totalorder %s2326_s21, 2  ;;  %s1319_s23 = sand.u32 1, %s2298_s14  }
 0x93d   : > { %p3233_p3 = scmp.ne.s32.totalorder %s3182_s20, 0  ;;  %s1320_s3 = scalar_lea.sflag [#allocation20], %s1319_s23 }
 0x93f   : > { %p1786_p5 = pnand %p1796_p7, %p3233_p3 }
 0x941   : > { %2269 = dma.done.wait (!%p1786_p5), %s1320_s3, 256  }
 0x942   : > { %2271 = vsyncadd (!%p1786_p5), %s1320_s3, 4294967040  ;;  %s38_s21 = sadd.s32 1, %s2326_s21   ;;  %s3235_s5 = sld [smem:[#allocation27_spill]] }
 0x943   : > { %p3033_p2 = scmp.ge.s32.totalorder %s38_s21, 8   ;;  %s3236_s28 = sld [smem:[#allocation28_spill]] }
 0x944   : > { %s3237_s6 = smov %s2723_s25  ;;  %s3238_s11 = sld [smem:[#allocation29_spill]] }
 0x945   : > { %s3239_s16 = sld [smem:[#allocation41_spill]]  ;;  %s3240_s18 = sld [smem:[#allocation32_spill]] }
 0x946   : > { %s3241_s20 = sld [smem:[#allocation37_spill]]  ;;  %s3242_s7 = sld [smem:[#allocation39_spill]] }
 0x947   : > { %s3244_s26 = smov %s2282_s27  ;;  %s3245_s27 = smov %s2728_s24 }
 0x948   : > { %s3243_s25 = smov %s3235_s5  ;;  %s3246_s29 = smov %s2294_s30 }
 0x949   : > { %s3247_s30 = smov %s3237_s6  ;;  %s3248_s14 = smov %s2302_s15 }
 0x94a   : > { %s3249_s15 = smov %s3238_s11  ;;  %s3250_s17 = smov %s2318_s19 }
 0x94b   :  { %37 = sbr.rel (!%p3033_p2) target bundleno = 29 (0x1d), region = 195 }
 0x94c   : > { %s3251_s19 = smov %s3241_s20  ;;  %s3252_s20 = smov %s3242_s7 }
 0x952   :  { %1325 = vsyncpa [#allocation8], 1 }
 0x953   :  { %1327 = vsyncpa [#allocation8 + $0x1], 1 }
 0x954   :  { %1328 = vsyncpa [#allocation11], 1 }
 0x955   :  { %1330 = vsyncpa [#allocation11 + $0x1], 1 }
 0x956   :  { %1331 = vsyncpa [#allocation14], 1 }
 0x957   :  { %1332 = vsyncpa [#allocation17], 1 }
 0x958   :  { %1334 = vsyncpa [#allocation17 + $0x1], 1 }
 0x959   :  { %1335 = vsyncpa [#allocation9], 1 }
 0x95a   :  { %1337 = vsyncpa [#allocation9 + $0x1], 1 }
 0x95b   :  { %1338 = vsyncpa [#allocation20], 1 }
 0x95c   :  { %1340 = vsyncpa [#allocation20 + $0x1], 1 }

</bundles_post_ra>
